<compile_context>
chip_gen: v7x
topology: tpu7x:2x2x1
jax: 0.10.0
libtpu: 0.0.40
codegen_flags: <defaults>
</compile_context>

<pallas_src>
import functools

import jax
import jax.numpy as jnp
from jax.experimental import pallas as pl
from jax.experimental.pallas import tpu as pltpu


def _fusion_mlp_kernel(x1_ref, x2_ref, x3_ref,
                       w1a_ref, w1b_ref, w1c_ref, b1_ref,
                       w2_ref, b2_ref, o_ref):
    # x*_ref : (TM, rF)  compute dtype      w1*_ref : (rF, rH)   b1_ref : (1, rH) f32
    # w2_ref : (rH, rF)  compute dtype      b2_ref  : (1, rF) f32
    # o_ref  : (TM, rF)  output dtype
    h = jnp.dot(x1_ref[...], w1a_ref[...], preferred_element_type=jnp.float32)
    h += jnp.dot(x2_ref[...], w1b_ref[...], preferred_element_type=jnp.float32)
    h += jnp.dot(x3_ref[...], w1c_ref[...], preferred_element_type=jnp.float32)
    h = jnp.maximum(h + b1_ref[...], 0.0)                       # bias + ReLU in f32 (VPU)
    y = jnp.dot(h.astype(w2_ref.dtype), w2_ref[...],
                preferred_element_type=jnp.float32) + b2_ref[...]
    o_ref[...] = y.astype(o_ref.dtype)


def _round_up(x, n):
    return ((x + n - 1) // n) * n


@functools.partial(
    jax.jit, static_argnames=("block_rows", "compute_dtype", "vmem_budget_bytes"))
def feature_aggregator_forward(feats, w1, b1, w2, b2, *,
                               block_rows=1024,
                               compute_dtype=jnp.bfloat16,
                               vmem_budget_bytes=20 * 1024 * 1024):
    """feats: tuple of 3 arrays, each [..., F].  Returns [..., F].

    w1: (3F, H)   b1: (1, H)   w2: (H, F)   b2: (1, F)
    """
    f1, f2, f3 = feats
    lead_shape = f1.shape[:-1]
    feat_dim = f1.shape[-1]
    hidden = w1.shape[-1]
    out_dtype = f1.dtype

    m = 1
    for d in lead_shape:
        m *= d

    # ---- lane-fold factor: pack r consecutive points into the 128-wide lane axis ----
    r = 1
    if feat_dim < 128 and 128 % feat_dim == 0:
        cand = 128 // feat_dim
        if m % cand == 0:
            r = cand
    rows = m // r
    rF = r * feat_dim
    rH = r * hidden

    # ---- split W1 into the three per-input slices; fold weights block-diagonally ----
    w1a = w1[:feat_dim]
    w1b = w1[feat_dim:2 * feat_dim]
    w1c = w1[2 * feat_dim:]
    if r > 1:
        eye = jnp.eye(r, dtype=w1.dtype)
        w1a = jnp.kron(eye, w1a)
        w1b = jnp.kron(eye, w1b)
        w1c = jnp.kron(eye, w1c)
        w2f = jnp.kron(eye, w2)
        b1f = jnp.tile(b1, (1, r))
        b2f = jnp.tile(b2, (1, r))
    else:
        w2f, b1f, b2f = w2, b1, b2

    cd = compute_dtype
    x1 = f1.reshape(rows, rF).astype(cd)       # contiguous reshape: free, no relayout
    x2 = f2.reshape(rows, rF).astype(cd)
    x3 = f3.reshape(rows, rF).astype(cd)
    w1a = w1a.astype(cd)
    w1b = w1b.astype(cd)
    w1c = w1c.astype(cd)
    w2f = w2f.astype(cd)
    b1f = b1f.astype(jnp.float32)              # biases stay f32 (added to f32 accumulator)
    b2f = b2f.astype(jnp.float32)

    # ---- row-tile size from a VMEM budget (conservative for v7x's 64 MiB VMEM) ----
    in_b = jnp.dtype(cd).itemsize
    out_b = jnp.dtype(out_dtype).itemsize
    # double-buffered x (3 inputs) + double-buffered out + f32 hidden intermediate
    per_row = 6 * rF * in_b + 2 * rF * out_b + rH * 4
    w_bytes = 4 * rF * rH * in_b + (rH + rF) * 4          # resident weights + f32 biases

    g = 16 if in_b < 4 else 8                              # sublane granularity for packed dtypes
    if rows <= g:
        tm = rows                                          # block == full array: always legal
    else:
        avail = max(vmem_budget_bytes - w_bytes, g * per_row)
        tm = max(g, min(block_rows, (avail // per_row) // g * g))
        tm = min(tm, _round_up(rows, g))
        if rows >= 2 * g:                                  # >=2 grid steps: v7x has 2 TCs
            tm = min(tm, _round_up(pl.cdiv(rows, 2), g))

    grid = (pl.cdiv(rows, tm),)

    est_vmem = tm * per_row + 2 * w_bytes
    vmem_limit = int(min(max(2 * est_vmem, 32 * 1024 * 1024), 48 * 1024 * 1024))

    # Single-buffer the resident weights only when the doubled copy would actually cost
    # meaningful VMEM; for tiny weights the default pipelining is left alone.
    single_buffer_weights = w_bytes >= 4 * 1024 * 1024

    def resident(shape):
        if single_buffer_weights:
            return pl.BlockSpec(shape, lambda i: (0, 0), pipeline_mode=pl.Buffered(1))
        return pl.BlockSpec(shape, lambda i: (0, 0))

    row_spec = pl.BlockSpec((tm, rF), lambda i: (i, 0))

    out = pl.pallas_call(
        _fusion_mlp_kernel,
        out_shape=jax.ShapeDtypeStruct((rows, rF), out_dtype),
        grid=grid,
        in_specs=[
            row_spec, row_spec, row_spec,                  # x1, x2, x3 row tiles
            resident((rF, rH)),                            # W1a (resident)
            resident((rF, rH)),                            # W1b
            resident((rF, rH)),                            # W1c
            resident((1, rH)),                             # b1
            resident((rH, rF)),                            # W2
            resident((1, rF)),                             # b2
        ],
        out_specs=pl.BlockSpec((tm, rF), lambda i: (i, 0)),
        compiler_params=pltpu.CompilerParams(
            dimension_semantics=("parallel",),
            vmem_limit_bytes=vmem_limit,
        ),
    )(x1, x2, x3, w1a, w1b, w1c, b1f, w2f, b2f)

    return out.reshape(*lead_shape, feat_dim)


def init_feature_aggregator_params(feature_dim, hidden=256, dtype=jnp.float32, seed=0):
    """Deterministic synthetic init (mimics PyTorch Linear's uniform fan-in scaling)."""
    key = jax.random.PRNGKey(seed)
    k1, k2, k3, k4 = jax.random.split(key, 4)
    in1 = 3 * feature_dim
    bound1 = 1.0 / jnp.sqrt(in1)
    bound2 = 1.0 / jnp.sqrt(hidden)
    w1 = jax.random.uniform(k1, (in1, hidden), dtype, -bound1, bound1)
    b1 = jax.random.uniform(k2, (1, hidden), dtype, -bound1, bound1)
    w2 = jax.random.uniform(k3, (hidden, feature_dim), dtype, -bound2, bound2)
    b2 = jax.random.uniform(k4, (1, feature_dim), dtype, -bound2, bound2)
    return w1, b1, w2, b2


def _reference_forward(feats, w1, b1, w2, b2, compute_dtype=jnp.bfloat16):
    # Same math in plain JAX, with the same bf16-operand / f32-accumulate precision.
    fused = jnp.concatenate(feats, axis=-1)
    h = jnp.dot(fused.astype(compute_dtype), w1.astype(compute_dtype),
                preferred_element_type=jnp.float32) + b1[0]
    h = jnp.maximum(h, 0.0)
    return jnp.dot(h.astype(compute_dtype), w2.astype(compute_dtype),
                   preferred_element_type=jnp.float32) + b2[0]


if __name__ == "__main__":
    feature_dim = 32
    batch, n_points = 2, 16

    key = jax.random.PRNGKey(0)
    kf1, kf2, kf3 = jax.random.split(key, 3)
    feats = (
        jax.random.normal(kf1, (batch, n_points, feature_dim), jnp.float32),
        jax.random.normal(kf2, (batch, n_points, feature_dim), jnp.float32),
        jax.random.normal(kf3, (batch, n_points, feature_dim), jnp.float32),
    )

    w1, b1, w2, b2 = init_feature_aggregator_params(feature_dim)

    out = feature_aggregator_forward(feats, w1, b1, w2, b2)
    out = jax.block_until_ready(out)

    ref = _reference_forward(feats, w1, b1, w2, b2)
    assert out.shape == (batch, n_points, feature_dim), out.shape
    max_err = float(jnp.max(jnp.abs(out - ref)))
    assert jnp.allclose(out, ref, atol=1e-2, rtol=1e-2), max_err

    print("KERNEL_OK")
</pallas_src>

<mosaic_0001>
module attributes {stable_mosaic.version = 11 : i64} {
  func.func @_fusion_mlp_kernel(%arg0: i32, %arg1: memref<8x128xbf16, #tpu.memory_space<vmem>>, %arg2: memref<8x128xbf16, #tpu.memory_space<vmem>>, %arg3: memref<8x128xbf16, #tpu.memory_space<vmem>>, %arg4: memref<128x1024xbf16, #tpu.memory_space<vmem>>, %arg5: memref<128x1024xbf16, #tpu.memory_space<vmem>>, %arg6: memref<128x1024xbf16, #tpu.memory_space<vmem>>, %arg7: memref<1x1024xf32, #tpu.memory_space<vmem>>, %arg8: memref<1024x128xbf16, #tpu.memory_space<vmem>>, %arg9: memref<1x128xf32, #tpu.memory_space<vmem>>, %arg10: memref<8x128xf32, #tpu.memory_space<vmem>>) attributes {dimension_semantics = [#tpu.dimension_semantics<parallel>], iteration_bounds = array<i64: 1>, scalar_prefetch = 0 : i64, scratch_operands = 0 : i64, tpu.core_type = #tpu.core_type<tc>, window_params = [{transform_indices = @transform_0, window_bounds = array<i64: 8, 128>}, {transform_indices = @transform_1, window_bounds = array<i64: 8, 128>}, {transform_indices = @transform_2, window_bounds = array<i64: 8, 128>}, {pipeline_mode = #tpu.pipeline_mode<synchronous>, transform_indices = @transform_3, window_bounds = array<i64: 128, 1024>}, {pipeline_mode = #tpu.pipeline_mode<synchronous>, transform_indices = @transform_4, window_bounds = array<i64: 128, 1024>}, {pipeline_mode = #tpu.pipeline_mode<synchronous>, transform_indices = @transform_5, window_bounds = array<i64: 128, 1024>}, {pipeline_mode = #tpu.pipeline_mode<synchronous>, transform_indices = @transform_6, window_bounds = array<i64: 1, 1024>}, {pipeline_mode = #tpu.pipeline_mode<synchronous>, transform_indices = @transform_7, window_bounds = array<i64: 1024, 128>}, {pipeline_mode = #tpu.pipeline_mode<synchronous>, transform_indices = @transform_8, window_bounds = array<i64: 1, 128>}, {transform_indices = @transform_9, window_bounds = array<i64: 8, 128>}]} {
    %c0 = arith.constant 0 : index
    %c0_0 = arith.constant 0 : index
    %0 = vector.load %arg1[%c0, %c0_0] : memref<8x128xbf16, #tpu.memory_space<vmem>>, vector<8x128xbf16>
    %c0_1 = arith.constant 0 : index
    %c0_2 = arith.constant 0 : index
    %1 = vector.load %arg4[%c0_1, %c0_2] : memref<128x1024xbf16, #tpu.memory_space<vmem>>, vector<128x1024xbf16>
    %cst = arith.constant dense<0.000000e+00> : vector<8x1024xf32>
    %2 = tpu.matmul %0, %1, %cst {dimension_numbers = #tpu.dot_dimension_numbers<[1], [0], [0], [1], [0, 0, 1, 1], [], []>} : vector<8x128xbf16>, vector<128x1024xbf16>, vector<8x1024xf32> -> vector<8x1024xf32>
    %c0_3 = arith.constant 0 : index
    %c0_4 = arith.constant 0 : index
    %3 = vector.load %arg2[%c0_3, %c0_4] : memref<8x128xbf16, #tpu.memory_space<vmem>>, vector<8x128xbf16>
    %c0_5 = arith.constant 0 : index
    %c0_6 = arith.constant 0 : index
    %4 = vector.load %arg5[%c0_5, %c0_6] : memref<128x1024xbf16, #tpu.memory_space<vmem>>, vector<128x1024xbf16>
    %cst_7 = arith.constant dense<0.000000e+00> : vector<8x1024xf32>
    %5 = tpu.matmul %3, %4, %cst_7 {dimension_numbers = #tpu.dot_dimension_numbers<[1], [0], [0], [1], [0, 0, 1, 1], [], []>} : vector<8x128xbf16>, vector<128x1024xbf16>, vector<8x1024xf32> -> vector<8x1024xf32>
    %6 = arith.addf %2, %5 : vector<8x1024xf32>
    %c0_8 = arith.constant 0 : index
    %c0_9 = arith.constant 0 : index
    %7 = vector.load %arg3[%c0_8, %c0_9] : memref<8x128xbf16, #tpu.memory_space<vmem>>, vector<8x128xbf16>
    %c0_10 = arith.constant 0 : index
    %c0_11 = arith.constant 0 : index
    %8 = vector.load %arg6[%c0_10, %c0_11] : memref<128x1024xbf16, #tpu.memory_space<vmem>>, vector<128x1024xbf16>
    %cst_12 = arith.constant dense<0.000000e+00> : vector<8x1024xf32>
    %9 = tpu.matmul %7, %8, %cst_12 {dimension_numbers = #tpu.dot_dimension_numbers<[1], [0], [0], [1], [0, 0, 1, 1], [], []>} : vector<8x128xbf16>, vector<128x1024xbf16>, vector<8x1024xf32> -> vector<8x1024xf32>
    %10 = arith.addf %6, %9 : vector<8x1024xf32>
    %c0_13 = arith.constant 0 : index
    %c0_14 = arith.constant 0 : index
    %11 = vector.load %arg7[%c0_13, %c0_14] : memref<1x1024xf32, #tpu.memory_space<vmem>>, vector<1x1024xf32>
    %12 = vector.broadcast %11 : vector<1x1024xf32> to vector<8x1024xf32>
    %13 = arith.addf %10, %12 : vector<8x1024xf32>
    %cst_15 = arith.constant 0.000000e+00 : f32
    %14 = vector.broadcast %cst_15 : f32 to vector<8x1024xf32>
    %15 = arith.maximumf %13, %14 : vector<8x1024xf32>
    %16 = arith.truncf %15 : vector<8x1024xf32> to vector<8x1024xbf16>
    %c0_16 = arith.constant 0 : index
    %c0_17 = arith.constant 0 : index
    %17 = vector.load %arg8[%c0_16, %c0_17] : memref<1024x128xbf16, #tpu.memory_space<vmem>>, vector<1024x128xbf16>
    %cst_18 = arith.constant dense<0.000000e+00> : vector<8x128xf32>
    %18 = tpu.matmul %16, %17, %cst_18 {dimension_numbers = #tpu.dot_dimension_numbers<[1], [0], [0], [1], [0, 0, 1, 1], [], []>} : vector<8x1024xbf16>, vector<1024x128xbf16>, vector<8x128xf32> -> vector<8x128xf32>
    %c0_19 = arith.constant 0 : index
    %c0_20 = arith.constant 0 : index
    %19 = vector.load %arg9[%c0_19, %c0_20] : memref<1x128xf32, #tpu.memory_space<vmem>>, vector<1x128xf32>
    %20 = vector.broadcast %19 : vector<1x128xf32> to vector<8x128xf32>
    %21 = arith.addf %18, %20 : vector<8x128xf32>
    %c0_21 = arith.constant 0 : index
    %c0_22 = arith.constant 0 : index
    %22 = vector.load %arg10[%c0_21, %c0_22] : memref<8x128xf32, #tpu.memory_space<vmem>>, vector<8x128xf32>
    tpu.vector_store %arg10[%c0_21, %c0_22], %21 {strides = array<i32>} : memref<8x128xf32, #tpu.memory_space<vmem>>, vector<8x128xf32>,
    return
  }
  func.func @transform_0(%arg0: i32) -> (i32, i32) {
    %c0_i32 = arith.constant 0 : i32
    %c0_i32_0 = arith.constant 0 : i32
    return %arg0, %c0_i32 : i32, i32
  }
  func.func @transform_1(%arg0: i32) -> (i32, i32) {
    %c0_i32 = arith.constant 0 : i32
    %c0_i32_0 = arith.constant 0 : i32
    return %arg0, %c0_i32 : i32, i32
  }
  func.func @transform_2(%arg0: i32) -> (i32, i32) {
    %c0_i32 = arith.constant 0 : i32
    %c0_i32_0 = arith.constant 0 : i32
    return %arg0, %c0_i32 : i32, i32
  }
  func.func @transform_3(%arg0: i32) -> (i32, i32) {
    %c0_i32 = arith.constant 0 : i32
    %c0_i32_0 = arith.constant 0 : i32
    %c0_i32_1 = arith.constant 0 : i32
    return %c0_i32, %c0_i32_0 : i32, i32
  }
  func.func @transform_4(%arg0: i32) -> (i32, i32) {
    %c0_i32 = arith.constant 0 : i32
    %c0_i32_0 = arith.constant 0 : i32
    %c0_i32_1 = arith.constant 0 : i32
    return %c0_i32, %c0_i32_0 : i32, i32
  }
  func.func @transform_5(%arg0: i32) -> (i32, i32) {
    %c0_i32 = arith.constant 0 : i32
    %c0_i32_0 = arith.constant 0 : i32
    %c0_i32_1 = arith.constant 0 : i32
    return %c0_i32, %c0_i32_0 : i32, i32
  }
  func.func @transform_6(%arg0: i32) -> (i32, i32) {
    %c0_i32 = arith.constant 0 : i32
    %c0_i32_0 = arith.constant 0 : i32
    %c0_i32_1 = arith.constant 0 : i32
    return %c0_i32, %c0_i32_0 : i32, i32
  }
  func.func @transform_7(%arg0: i32) -> (i32, i32) {
    %c0_i32 = arith.constant 0 : i32
    %c0_i32_0 = arith.constant 0 : i32
    %c0_i32_1 = arith.constant 0 : i32
    return %c0_i32, %c0_i32_0 : i32, i32
  }
  func.func @transform_8(%arg0: i32) -> (i32, i32) {
    %c0_i32 = arith.constant 0 : i32
    %c0_i32_0 = arith.constant 0 : i32
    %c0_i32_1 = arith.constant 0 : i32
    return %c0_i32, %c0_i32_0 : i32, i32
  }
  func.func @transform_9(%arg0: i32) -> (i32, i32) {
    %c0_i32 = arith.constant 0 : i32
    %c0_i32_0 = arith.constant 0 : i32
    return %arg0, %c0_i32 : i32, i32
  }
}

</mosaic_0001>

<bundles_post_ra>
// kernel: feature_aggregator_forward.1
= control target key start
LH: loop header
LB: loop body
LE: loop exit
PB: predicated region body
PF: predicated region fallthrough
CT: control target
= control target key end

     0   :  { %v2848_v3 = vmov 0   ;;  %s3747_s4 = inlined_call_operand.vmem [shape: bf16[128,1024], index: 4, kind: input, shape index: {}]   ;;  %s3748_s1 = inlined_call_operand.vmem [shape: bf16[8,128], index: 1, kind: input, shape index: {}]   ;;  %s3749_s3 = inlined_call_operand.vmem [shape: bf16[128,1024], index: 3, kind: input, shape index: {}]   ;;  %s3750_s0 = inlined_call_operand.vmem [shape: bf16[8,128], index: 0, kind: input, shape index: {}]   ;;  %s3751_s5 = inlined_call_operand.vmem [shape: bf16[128,1024], index: 5, kind: input, shape index: {}]   ;;  %s3752_s2 = inlined_call_operand.vmem [shape: bf16[8,128], index: 2, kind: input, shape index: {}]   ;;  %s3753_s7 = inlined_call_operand.vmem [shape: bf16[1024,128], index: 7, kind: input, shape index: {}]   ;;  %s3754_s6 = inlined_call_operand.vmem [shape: f32[1,1024], index: 6, kind: input, shape index: {}]   ;;  %s3755_s8 = inlined_call_operand.vmem [shape: f32[1,128], index: 8, kind: input, shape index: {}]   ;;  %s3756_s9 = inlined_call_operand.vmem [shape: f32[8,128], index: 9, kind: output, shape index: {}]  }
   0x1   :  { %v99_v0 = vld [vmem:[%s3747_s4] sm:$0xff]  ;;  %v100_v2 = vld [vmem:[%s3747_s4 + $0x8] sm:$0xff]  ;;  %515 = vmatprep.mubr.bf16.mxu0 %v2848_v3  ;;  %556 = vmatprep.mubr.bf16.mxu1 %v2848_v3  ;;  %v101_v63 = vld [vmem:[%s3747_s4 + $0x10] sm:$0xff] }
   0x2   :  { %v103_v1 = vld [vmem:[%s3747_s4 + $0x20] sm:$0xff]  ;;  %v104_v5 = vld [vmem:[%s3747_s4 + $0x28] sm:$0xff] }
   0x3   :  { %v2439_v4 = vcombine.high %v99_v0, %v103_v1  ;;  %v2438_v6 = vcombine.low %v99_v0, %v103_v1  ;;  %v107_v7 = vld [vmem:[%s3747_s4 + $0x40] sm:$0xff]  ;;  %v2441_v9 = vcombine.high %v100_v2, %v104_v5  ;;  %v2440_v10 = vcombine.low %v100_v2, %v104_v5  ;;  %v108_v12 = vld [vmem:[%s3747_s4 + $0x48] sm:$0xff]  ;;  %v105_v0 = vld [vmem:[%s3747_s4 + $0x30] sm:$0xff] }
   0x4   :  { %v111_v8 = vld [vmem:[%s3747_s4 + $0x60] sm:$0xff]  ;;  %v112_v13 = vld [vmem:[%s3747_s4 + $0x68] sm:$0xff]  ;;  %v102_v1 = vld [vmem:[%s3747_s4 + $0x18] sm:$0xff] }
   0x5   :  { %v2447_v11 = vcombine.high %v107_v7, %v111_v8  ;;  %v115_v14 = vld [vmem:[%s3747_s4 + $0x80] sm:$0xff]  ;;  %483 = vmatprep.subr.bf16.mxu0 %v2439_v4  ;;  %v2449_v15 = vcombine.high %v108_v12, %v112_v13  ;;  %v116_v17 = vld [vmem:[%s3747_s4 + $0x88] sm:$0xff]  ;;  %524 = vmatprep.subr.bf16.mxu1 %v2441_v9  ;;  %v2446_v19 = vcombine.low %v107_v7, %v111_v8  ;;  %v106_v2 = vld [vmem:[%s3747_s4 + $0x38] sm:$0xff] }
   0x6   :  { %v119_v16 = vld [vmem:[%s3747_s4 + $0xa0] sm:$0xff]  ;;  %v120_v18 = vld [vmem:[%s3747_s4 + $0xa8] sm:$0xff]  ;;  %484 = vmatpush1.bf16.msra.mxu0 %v2438_v6  ;;  %525 = vmatpush1.bf16.msra.mxu1 %v2440_v10  ;;  %v2448_v20 = vcombine.low %v108_v12, %v112_v13  ;;  %v2443_v6 = vcombine.high %v101_v63, %v105_v0  ;;  %v2445_v7 = vcombine.high %v102_v1, %v106_v2  ;;  %v109_v8 = vld [vmem:[%s3747_s4 + $0x50] sm:$0xff] }
   0x7   :  { %485 = vmatprep.subr.bf16.mxu0 %v2447_v11  ;;  %v2455_v21 = vcombine.high %v115_v14, %v119_v16  ;;  %526 = vmatprep.subr.bf16.mxu1 %v2449_v15  ;;  %v2457_v22 = vcombine.high %v116_v17, %v120_v18  ;;  %v123_v23 = vld [vmem:[%s3747_s4 + $0xc0] sm:$0xff]  ;;  %v124_v25 = vld [vmem:[%s3747_s4 + $0xc8] sm:$0xff]  ;;  %v2454_v27 = vcombine.low %v115_v14, %v119_v16  ;;  %v113_v9 = vld [vmem:[%s3747_s4 + $0x70] sm:$0xff] }
   0x8   :  { %v127_v24 = vld [vmem:[%s3747_s4 + $0xe0] sm:$0xff]  ;;  %v128_v26 = vld [vmem:[%s3747_s4 + $0xe8] sm:$0xff]  ;;  %v2456_v28 = vcombine.low %v116_v17, %v120_v18  ;;  %v110_v10 = vld [vmem:[%s3747_s4 + $0x58] sm:$0xff]  ;;  %v2442_v13 = vcombine.low %v101_v63, %v105_v0  ;;  %v2444_v14 = vcombine.low %v102_v1, %v106_v2  ;;  %v2451_v15 = vcombine.high %v109_v8, %v113_v9 }
   0x9   :  { %v2463_v29 = vcombine.high %v123_v23, %v127_v24  ;;  %v2465_v30 = vcombine.high %v124_v25, %v128_v26  ;;  %v131_v31 = vld [vmem:[%s3747_s4 + $0x100] sm:$0xff]  ;;  %v132_v33 = vld [vmem:[%s3747_s4 + $0x108] sm:$0xff]  ;;  %v2462_v35 = vcombine.low %v123_v23, %v127_v24  ;;  %v2464_v36 = vcombine.low %v124_v25, %v128_v26  ;;  %v114_v11 = vld [vmem:[%s3747_s4 + $0x78] sm:$0xff] }
   0xa   :  { %486 = vmatpush1.bf16.msra.mxu0 %v2446_v19  ;;  %527 = vmatpush1.bf16.msra.mxu1 %v2448_v20  ;;  %v135_v32 = vld [vmem:[%s3747_s4 + $0x120] sm:$0xff]  ;;  %v136_v34 = vld [vmem:[%s3747_s4 + $0x128] sm:$0xff]  ;;  %v2453_v16 = vcombine.high %v110_v10, %v114_v11  ;;  %v117_v17 = vld [vmem:[%s3747_s4 + $0x90] sm:$0xff] }
   0xb   :  { %487 = vmatprep.subr.bf16.mxu0 %v2455_v21  ;;  %528 = vmatprep.subr.bf16.mxu1 %v2457_v22  ;;  %v2471_v37 = vcombine.high %v131_v31, %v135_v32  ;;  %v2473_v38 = vcombine.high %v132_v33, %v136_v34  ;;  %v139_v39 = vld [vmem:[%s3747_s4 + $0x140] sm:$0xff]  ;;  %v140_v41 = vld [vmem:[%s3747_s4 + $0x148] sm:$0xff]  ;;  %v2470_v43 = vcombine.low %v131_v31, %v135_v32  ;;  %v121_v18 = vld [vmem:[%s3747_s4 + $0xb0] sm:$0xff] }
   0xc   :  { %v143_v40 = vld [vmem:[%s3747_s4 + $0x160] sm:$0xff]  ;;  %v144_v42 = vld [vmem:[%s3747_s4 + $0x168] sm:$0xff]  ;;  %v2472_v44 = vcombine.low %v132_v33, %v136_v34  ;;  %v118_v19 = vld [vmem:[%s3747_s4 + $0x98] sm:$0xff]  ;;  %v2450_v21 = vcombine.low %v109_v8, %v113_v9  ;;  %v2452_v22 = vcombine.low %v110_v10, %v114_v11  ;;  %v2459_v23 = vcombine.high %v117_v17, %v121_v18 }
   0xd   :  { %v2479_v45 = vcombine.high %v139_v39, %v143_v40  ;;  %v2481_v46 = vcombine.high %v140_v41, %v144_v42  ;;  %v147_v47 = vld [vmem:[%s3747_s4 + $0x180] sm:$0xff]  ;;  %v148_v49 = vld [vmem:[%s3747_s4 + $0x188] sm:$0xff]  ;;  %v2478_v51 = vcombine.low %v139_v39, %v143_v40  ;;  %v2480_v52 = vcombine.low %v140_v41, %v144_v42  ;;  %v122_v20 = vld [vmem:[%s3747_s4 + $0xb8] sm:$0xff] }
   0xe   :  { %488 = vmatpush1.bf16.msra.mxu0 %v2454_v27  ;;  %529 = vmatpush1.bf16.msra.mxu1 %v2456_v28  ;;  %v151_v48 = vld [vmem:[%s3747_s4 + $0x1a0] sm:$0xff]  ;;  %v152_v50 = vld [vmem:[%s3747_s4 + $0x1a8] sm:$0xff]  ;;  %v2461_v24 = vcombine.high %v118_v19, %v122_v20  ;;  %v125_v25 = vld [vmem:[%s3747_s4 + $0xd0] sm:$0xff] }
   0xf   :  { %489 = vmatprep.subr.bf16.mxu0 %v2463_v29  ;;  %530 = vmatprep.subr.bf16.mxu1 %v2465_v30  ;;  %v2487_v53 = vcombine.high %v147_v47, %v151_v48  ;;  %v2489_v54 = vcombine.high %v148_v49, %v152_v50  ;;  %v155_v55 = vld [vmem:[%s3747_s4 + $0x1c0] sm:$0xff]  ;;  %v156_v57 = vld [vmem:[%s3747_s4 + $0x1c8] sm:$0xff]  ;;  %v2486_v59 = vcombine.low %v147_v47, %v151_v48  ;;  %v129_v26 = vld [vmem:[%s3747_s4 + $0xf0] sm:$0xff] }
  0x10   :  { %v159_v56 = vld [vmem:[%s3747_s4 + $0x1e0] sm:$0xff]  ;;  %v160_v58 = vld [vmem:[%s3747_s4 + $0x1e8] sm:$0xff]  ;;  %v2488_v60 = vcombine.low %v148_v49, %v152_v50  ;;  %v126_v27 = vld [vmem:[%s3747_s4 + $0xd8] sm:$0xff]  ;;  %v2458_v29 = vcombine.low %v117_v17, %v121_v18  ;;  %v2460_v30 = vcombine.low %v118_v19, %v122_v20  ;;  %v2467_v31 = vcombine.high %v125_v25, %v129_v26 }
  0x11   :  { %v2495_v61 = vcombine.high %v155_v55, %v159_v56  ;;  %v2497_v62 = vcombine.high %v156_v57, %v160_v58  ;;  %v2494_v4 = vcombine.low %v155_v55, %v159_v56  ;;  %v2496_v5 = vcombine.low %v156_v57, %v160_v58  ;;  %v3024_v12 = vld [vmem:[%s3748_s1] sm:$0xf]  ;;  %v130_v28 = vld [vmem:[%s3747_s4 + $0xf8] sm:$0xff]  ;;  %v133_v33 = vld [vmem:[%s3747_s4 + $0x110] sm:$0xff] }
  0x12   :  { %490 = vmatpush1.bf16.msra.mxu0 %v2462_v35  ;;  %531 = vmatpush1.bf16.msra.mxu1 %v2464_v36  ;;  %v2469_v32 = vcombine.high %v126_v27, %v130_v28  ;;  %v137_v34 = vld [vmem:[%s3747_s4 + $0x130] sm:$0xff]  ;;  %v134_v35 = vld [vmem:[%s3747_s4 + $0x118] sm:$0xff]  ;;  %v34_v1 = vld [vmem:[%s3749_s3] sm:$0xff] }
  0x13   :  { %491 = vmatprep.subr.bf16.mxu0 %v2471_v37  ;;  %532 = vmatprep.subr.bf16.mxu1 %v2473_v38  ;;  %v138_v36 = vld [vmem:[%s3747_s4 + $0x138] sm:$0xff]  ;;  %v2466_v37 = vcombine.low %v125_v25, %v129_v26  ;;  %v2468_v38 = vcombine.low %v126_v27, %v130_v28  ;;  %v2475_v39 = vcombine.high %v133_v33, %v137_v34  ;;  %v141_v41 = vld [vmem:[%s3747_s4 + $0x150] sm:$0xff]  ;;  %v38_v2 = vld [vmem:[%s3749_s3 + $0x20] sm:$0xff] }
  0x14   :  { %v2477_v40 = vcombine.high %v134_v35, %v138_v36  ;;  %v145_v42 = vld [vmem:[%s3747_s4 + $0x170] sm:$0xff]  ;;  %v2503_v8 = vcombine.high %v34_v1, %v38_v2  ;;  %v42_v10 = vld [vmem:[%s3749_s3 + $0x40] sm:$0xff] }
  0x15   :  { %v2483_v47 = vcombine.high %v141_v41, %v145_v42  ;;  %v149_v49 = vld [vmem:[%s3747_s4 + $0x190] sm:$0xff]  ;;  %v46_v11 = vld [vmem:[%s3749_s3 + $0x60] sm:$0xff] }
  0x16   :  { %492 = vmatpush1.bf16.msra.mxu0 %v2470_v43  ;;  %533 = vmatpush1.bf16.msra.mxu1 %v2472_v44  ;;  %v142_v43 = vld [vmem:[%s3747_s4 + $0x158] sm:$0xff]  ;;  %v153_v50 = vld [vmem:[%s3747_s4 + $0x1b0] sm:$0xff]  ;;  %v2511_v17 = vcombine.high %v42_v10, %v46_v11  ;;  %v50_v19 = vld [vmem:[%s3749_s3 + $0x80] sm:$0xff] }
  0x17   :  { %493 = vmatprep.subr.bf16.mxu0 %v2479_v45  ;;  %534 = vmatprep.subr.bf16.mxu1 %v2481_v46  ;;  %v146_v44 = vld [vmem:[%s3747_s4 + $0x178] sm:$0xff]  ;;  %v2474_v45 = vcombine.low %v133_v33, %v137_v34  ;;  %v2476_v46 = vcombine.low %v134_v35, %v138_v36  ;;  %v2491_v55 = vcombine.high %v149_v49, %v153_v50  ;;  %v157_v57 = vld [vmem:[%s3747_s4 + $0x1d0] sm:$0xff]  ;;  %v54_v20 = vld [vmem:[%s3749_s3 + $0xa0] sm:$0xff] }
  0x18   :  { %v2485_v48 = vcombine.high %v142_v43, %v146_v44  ;;  %v161_v58 = vld [vmem:[%s3747_s4 + $0x1f0] sm:$0xff]  ;;  %v2519_v25 = vcombine.high %v50_v19, %v54_v20  ;;  %v58_v27 = vld [vmem:[%s3749_s3 + $0xc0] sm:$0xff]  ;;  %v67_v36 = vld [vmem:[%s3749_s3 + $0x108] sm:$0xff] }
  0x19   :  { %v2499_v63 = vcombine.high %v157_v57, %v161_v58  ;;  %v62_v28 = vld [vmem:[%s3749_s3 + $0xe0] sm:$0xff] }
  0x1a   :  { %494 = vmatpush1.bf16.msra.mxu0 %v2478_v51  ;;  %535 = vmatpush1.bf16.msra.mxu1 %v2480_v52  ;;  %v150_v51 = vld [vmem:[%s3747_s4 + $0x198] sm:$0xff]  ;;  %v66_v34 = vld [vmem:[%s3749_s3 + $0x100] sm:$0xff] }
  0x1b   :  { %495 = vmatprep.subr.bf16.mxu0 %v2487_v53  ;;  %536 = vmatprep.subr.bf16.mxu1 %v2489_v54  ;;  %v154_v52 = vld [vmem:[%s3747_s4 + $0x1b8] sm:$0xff]  ;;  %v2482_v53 = vcombine.low %v141_v41, %v145_v42  ;;  %v2484_v54 = vcombine.low %v142_v43, %v146_v44  ;;  %v70_v35 = vld [vmem:[%s3749_s3 + $0x120] sm:$0xff]  ;;  %v75_v44 = vld [vmem:[%s3749_s3 + $0x148] sm:$0xff] }
  0x1c   :  { %v2493_v56 = vcombine.high %v150_v51, %v154_v52  ;;  %v74_v42 = vld [vmem:[%s3749_s3 + $0x140] sm:$0xff] }
  0x1d   :  { %v78_v43 = vld [vmem:[%s3749_s3 + $0x160] sm:$0xff] }
  0x1e   :  { %496 = vmatpush1.bf16.msra.mxu0 %v2486_v59  ;;  %537 = vmatpush1.bf16.msra.mxu1 %v2488_v60  ;;  %v158_v59 = vld [vmem:[%s3747_s4 + $0x1d8] sm:$0xff] }
  0x1f   :  { %497 = vmatprep.subr.bf16.mxu0 %v2495_v61  ;;  %538 = vmatprep.subr.bf16.mxu1 %v2497_v62  ;;  %v162_v60 = vld [vmem:[%s3747_s4 + $0x1f8] sm:$0xff]  ;;  %v2490_v61 = vcombine.low %v149_v49, %v153_v50  ;;  %v2492_v62 = vcombine.low %v150_v51, %v154_v52  ;;  %v82_v50 = vld [vmem:[%s3749_s3 + $0x180] sm:$0xff]  ;;  %v83_v52 = vld [vmem:[%s3749_s3 + $0x188] sm:$0xff] }
  0x20   :  { %v2501_v0 = vcombine.high %v158_v59, %v162_v60  ;;  %v86_v51 = vld [vmem:[%s3749_s3 + $0x1a0] sm:$0xff] }
  0x22   :  { %498 = vmatpush1.bf16.msra.mxu0 %v2494_v4  ;;  %539 = vmatpush1.bf16.msra.mxu1 %v2496_v5  ;;  %v35_v4 = vld [vmem:[%s3749_s3 + $0x8] sm:$0xff] }
  0x23   :  { %565 = vmatprep.subr.bf16.mxu0 %v2443_v6  ;;  %606 = vmatprep.subr.bf16.mxu1 %v2445_v7  ;;  %v39_v5 = vld [vmem:[%s3749_s3 + $0x28] sm:$0xff]  ;;  %v2498_v6 = vcombine.low %v157_v57, %v161_v58  ;;  %v2500_v7 = vcombine.low %v158_v59, %v162_v60  ;;  %v90_v58 = vld [vmem:[%s3749_s3 + $0x1c0] sm:$0xff] }
  0x24   :  { %v2505_v9 = vcombine.high %v35_v4, %v39_v5  ;;  %v94_v59 = vld [vmem:[%s3749_s3 + $0x1e0] sm:$0xff]  ;;  %v91_v60 = vld [vmem:[%s3749_s3 + $0x1c8] sm:$0xff] }
  0x25   :  { %516 = vmatmul.mubr.bf16.vlgmr.msra.gmra.mrb[0].mxu0 %v3024_v12  ;;  %557 = vmatmul.mubr.bf16.vlgmr.msra.gmra.mrb[0].mxu1 %v3024_v12 }
  0x26   :  { %566 = vmatpush1.bf16.msra.mxu0 %v2442_v13  ;;  %607 = vmatpush1.bf16.msra.mxu1 %v2444_v14  ;;  %v43_v13 = vld [vmem:[%s3749_s3 + $0x48] sm:$0xff] }
  0x27   :  { %567 = vmatprep.subr.bf16.mxu0 %v2451_v15  ;;  %608 = vmatprep.subr.bf16.mxu1 %v2453_v16  ;;  %v47_v14 = vld [vmem:[%s3749_s3 + $0x68] sm:$0xff]  ;;  %v2502_v15 = vcombine.low %v34_v1, %v38_v2  ;;  %v2504_v16 = vcombine.low %v35_v4, %v39_v5  ;;  %v36_v2 = vld [vmem:[%s3749_s3 + $0x10] sm:$0xff]  ;;  %v37_v5 = vld [vmem:[%s3749_s3 + $0x18] sm:$0xff] }
  0x28   :  { %597 = vmatprep.mubr.bf16.mxu0 %v2848_v3  ;;  %638 = vmatprep.mubr.bf16.mxu1 %v2848_v3  ;;  %v2513_v18 = vcombine.high %v43_v13, %v47_v14  ;;  %v40_v4 = vld [vmem:[%s3749_s3 + $0x30] sm:$0xff] }
  0x2a   :  { %568 = vmatpush1.bf16.msra.mxu0 %v2450_v21  ;;  %609 = vmatpush1.bf16.msra.mxu1 %v2452_v22  ;;  %v51_v21 = vld [vmem:[%s3749_s3 + $0x88] sm:$0xff] }
  0x2b   :  { %569 = vmatprep.subr.bf16.mxu0 %v2459_v23  ;;  %610 = vmatprep.subr.bf16.mxu1 %v2461_v24  ;;  %v55_v22 = vld [vmem:[%s3749_s3 + $0xa8] sm:$0xff]  ;;  %v2510_v23 = vcombine.low %v42_v10, %v46_v11  ;;  %v2512_v24 = vcombine.low %v43_v13, %v47_v14  ;;  %v44_v11 = vld [vmem:[%s3749_s3 + $0x50] sm:$0xff]  ;;  %v45_v14 = vld [vmem:[%s3749_s3 + $0x58] sm:$0xff] }
  0x2c   :  { %v2521_v26 = vcombine.high %v51_v21, %v55_v22  ;;  %v48_v13 = vld [vmem:[%s3749_s3 + $0x70] sm:$0xff] }
  0x2e   :  { %570 = vmatpush1.bf16.msra.mxu0 %v2458_v29  ;;  %611 = vmatpush1.bf16.msra.mxu1 %v2460_v30  ;;  %v63_v29 = vld [vmem:[%s3749_s3 + $0xe8] sm:$0xff]  ;;  %v2518_v30 = vcombine.low %v50_v19, %v54_v20  ;;  %v2515_v19 = vcombine.high %v44_v11, %v48_v13 }
  0x2f   :  { %571 = vmatprep.subr.bf16.mxu0 %v2467_v31  ;;  %612 = vmatprep.subr.bf16.mxu1 %v2469_v32  ;;  %v2520_v31 = vcombine.low %v51_v21, %v55_v22  ;;  %v2527_v32 = vcombine.high %v58_v27, %v62_v28  ;;  %v52_v21 = vld [vmem:[%s3749_s3 + $0x90] sm:$0xff] }
  0x30   :  { %v56_v22 = vld [vmem:[%s3749_s3 + $0xb0] sm:$0xff] }
  0x32   :  { %572 = vmatpush1.bf16.msra.mxu0 %v2466_v37  ;;  %613 = vmatpush1.bf16.msra.mxu1 %v2468_v38  ;;  %v71_v37 = vld [vmem:[%s3749_s3 + $0x128] sm:$0xff]  ;;  %v2526_v38 = vcombine.low %v58_v27, %v62_v28  ;;  %v2523_v27 = vcombine.high %v52_v21, %v56_v22 }
  0x33   :  { %573 = vmatprep.subr.bf16.mxu0 %v2475_v39  ;;  %614 = vmatprep.subr.bf16.mxu1 %v2477_v40  ;;  %v2535_v40 = vcombine.high %v66_v34, %v70_v35  ;;  %v2537_v41 = vcombine.high %v67_v36, %v71_v37 }
  0x36   :  { %574 = vmatpush1.bf16.msra.mxu0 %v2474_v45  ;;  %615 = vmatpush1.bf16.msra.mxu1 %v2476_v46  ;;  %v79_v45 = vld [vmem:[%s3749_s3 + $0x168] sm:$0xff]  ;;  %v2534_v46 = vcombine.low %v66_v34, %v70_v35 }
  0x37   :  { %575 = vmatprep.subr.bf16.mxu0 %v2483_v47  ;;  %616 = vmatprep.subr.bf16.mxu1 %v2485_v48  ;;  %v2536_v47 = vcombine.low %v67_v36, %v71_v37  ;;  %v2543_v48 = vcombine.high %v74_v42, %v78_v43  ;;  %v2545_v49 = vcombine.high %v75_v44, %v79_v45  ;;  %v68_v36 = vld [vmem:[%s3749_s3 + $0x110] sm:$0xff] }
  0x38   :  { %v72_v37 = vld [vmem:[%s3749_s3 + $0x130] sm:$0xff] }
  0x3a   :  { %576 = vmatpush1.bf16.msra.mxu0 %v2482_v53  ;;  %617 = vmatpush1.bf16.msra.mxu1 %v2484_v54  ;;  %v87_v53 = vld [vmem:[%s3749_s3 + $0x1a8] sm:$0xff]  ;;  %v2542_v54 = vcombine.low %v74_v42, %v78_v43  ;;  %v2539_v42 = vcombine.high %v68_v36, %v72_v37 }
  0x3b   :  { %577 = vmatprep.subr.bf16.mxu0 %v2491_v55  ;;  %618 = vmatprep.subr.bf16.mxu1 %v2493_v56  ;;  %v2544_v55 = vcombine.low %v75_v44, %v79_v45  ;;  %v2551_v56 = vcombine.high %v82_v50, %v86_v51  ;;  %v2553_v57 = vcombine.high %v83_v52, %v87_v53  ;;  %v76_v44 = vld [vmem:[%s3749_s3 + $0x150] sm:$0xff] }
  0x3c   :  { %v80_v45 = vld [vmem:[%s3749_s3 + $0x170] sm:$0xff] }
  0x3e   :  { %578 = vmatpush1.bf16.msra.mxu0 %v2490_v61  ;;  %619 = vmatpush1.bf16.msra.mxu1 %v2492_v62  ;;  %v95_v61 = vld [vmem:[%s3749_s3 + $0x1e8] sm:$0xff]  ;;  %v2550_v62 = vcombine.low %v82_v50, %v86_v51  ;;  %v2547_v50 = vcombine.high %v76_v44, %v80_v45 }
  0x3f   :  { %579 = vmatprep.subr.bf16.mxu0 %v2499_v63  ;;  %620 = vmatprep.subr.bf16.mxu1 %v2501_v0  ;;  %v2552_v63 = vcombine.low %v83_v52, %v87_v53  ;;  %v2559_v0 = vcombine.high %v90_v58, %v94_v59  ;;  %v2561_v1 = vcombine.high %v91_v60, %v95_v61  ;;  %v84_v52 = vld [vmem:[%s3749_s3 + $0x190] sm:$0xff] }
  0x40   :  { %v88_v53 = vld [vmem:[%s3749_s3 + $0x1b0] sm:$0xff] }
  0x42   :  { %580 = vmatpush1.bf16.msra.mxu0 %v2498_v6  ;;  %621 = vmatpush1.bf16.msra.mxu1 %v2500_v7  ;;  %v41_v6 = vld [vmem:[%s3749_s3 + $0x38] sm:$0xff]  ;;  %v2558_v7 = vcombine.low %v90_v58, %v94_v59  ;;  %v2555_v58 = vcombine.high %v84_v52, %v88_v53 }
  0x43   :  { %967 = vmatprep.subr.bf16.mxu0 %v2503_v8  ;;  %1008 = vmatprep.subr.bf16.mxu1 %v2505_v9  ;;  %v2560_v8 = vcombine.low %v91_v60, %v95_v61  ;;  %v2507_v9 = vcombine.high %v36_v2, %v40_v4  ;;  %v2509_v10 = vcombine.high %v37_v5, %v41_v6  ;;  %v92_v60 = vld [vmem:[%s3749_s3 + $0x1d0] sm:$0xff] }
  0x44   :  { %v96_v61 = vld [vmem:[%s3749_s3 + $0x1f0] sm:$0xff] }
  0x45   :  { %598 = vmatmul.mubr.bf16.vlgmr.msra.gmra.mrb[4].mxu0 %v3024_v12  ;;  %639 = vmatmul.mubr.bf16.vlgmr.msra.gmra.mrb[4].mxu1 %v3024_v12  ;;  %v59_v12 = vld [vmem:[%s3749_s3 + $0xc8] sm:$0xff] }
  0x46   :  { %968 = vmatpush1.bf16.msra.mxu0 %v2502_v15  ;;  %1009 = vmatpush1.bf16.msra.mxu1 %v2504_v16  ;;  %v2529_v33 = vcombine.high %v59_v12, %v63_v29  ;;  %v2528_v39 = vcombine.low %v59_v12, %v63_v29  ;;  %v49_v15 = vld [vmem:[%s3749_s3 + $0x78] sm:$0xff]  ;;  %v3229_v16 = vld [vmem:[%s3750_s0] sm:$0xf]  ;;  %v60_v12 = vld [vmem:[%s3749_s3 + $0xd0] sm:$0xff] }
  0x47   :  { %969 = vmatprep.subr.bf16.mxu0 %v2511_v17  ;;  %1010 = vmatprep.subr.bf16.mxu1 %v2513_v18  ;;  %v2506_v17 = vcombine.low %v36_v2, %v40_v4  ;;  %v2508_v18 = vcombine.low %v37_v5, %v41_v6  ;;  %v2517_v20 = vcombine.high %v45_v14, %v49_v15  ;;  %v64_v29 = vld [vmem:[%s3749_s3 + $0xf0] sm:$0xff]  ;;  %v1132_v5 = vld [vmem:[%s3751_s5] sm:$0xff] }
  0x48   :  { %999 = vmatprep.mubr.bf16.mxu0 %v2848_v3  ;;  %1040 = vmatprep.mubr.bf16.mxu1 %v2848_v3  ;;  %v2531_v34 = vcombine.high %v60_v12, %v64_v29  ;;  %v2563_v2 = vcombine.high %v92_v60, %v96_v61  ;;  %v1136_v6 = vld [vmem:[%s3751_s5 + $0x20] sm:$0xff] }
  0x4a   :  { %970 = vmatpush1.bf16.msra.mxu0 %v2510_v23  ;;  %1011 = vmatpush1.bf16.msra.mxu1 %v2512_v24  ;;  %v53_v23 = vld [vmem:[%s3749_s3 + $0x98] sm:$0xff] }
  0x4b   :  { %971 = vmatprep.subr.bf16.mxu0 %v2519_v25  ;;  %1012 = vmatprep.subr.bf16.mxu1 %v2521_v26  ;;  %v57_v24 = vld [vmem:[%s3749_s3 + $0xb8] sm:$0xff]  ;;  %v2514_v25 = vcombine.low %v44_v11, %v48_v13  ;;  %v2516_v26 = vcombine.low %v45_v14, %v49_v15  ;;  %v2567_v11 = vcombine.high %v1132_v5, %v1136_v6  ;;  %v1140_v14 = vld [vmem:[%s3751_s5 + $0x40] sm:$0xff] }
  0x4c   :  { %v2525_v28 = vcombine.high %v53_v23, %v57_v24  ;;  %v1144_v15 = vld [vmem:[%s3751_s5 + $0x60] sm:$0xff] }
  0x4e   :  { %972 = vmatpush1.bf16.msra.mxu0 %v2518_v30  ;;  %1013 = vmatpush1.bf16.msra.mxu1 %v2520_v31  ;;  %v61_v30 = vld [vmem:[%s3749_s3 + $0xd8] sm:$0xff] }
  0x4f   :  { %973 = vmatprep.subr.bf16.mxu0 %v2527_v32  ;;  %1014 = vmatprep.subr.bf16.mxu1 %v2529_v33  ;;  %v65_v31 = vld [vmem:[%s3749_s3 + $0xf8] sm:$0xff]  ;;  %v2522_v32 = vcombine.low %v52_v21, %v56_v22  ;;  %v2524_v33 = vcombine.low %v53_v23, %v57_v24  ;;  %v2575_v21 = vcombine.high %v1140_v14, %v1144_v15  ;;  %v1148_v23 = vld [vmem:[%s3751_s5 + $0x80] sm:$0xff] }
  0x50   :  { %v2533_v35 = vcombine.high %v61_v30, %v65_v31  ;;  %v1152_v24 = vld [vmem:[%s3751_s5 + $0xa0] sm:$0xff] }
  0x52   :  { %974 = vmatpush1.bf16.msra.mxu0 %v2526_v38  ;;  %1015 = vmatpush1.bf16.msra.mxu1 %v2528_v39  ;;  %v69_v38 = vld [vmem:[%s3749_s3 + $0x118] sm:$0xff] }
  0x53   :  { %975 = vmatprep.subr.bf16.mxu0 %v2535_v40  ;;  %1016 = vmatprep.subr.bf16.mxu1 %v2537_v41  ;;  %v73_v39 = vld [vmem:[%s3749_s3 + $0x138] sm:$0xff]  ;;  %v2530_v40 = vcombine.low %v60_v12, %v64_v29  ;;  %v2532_v41 = vcombine.low %v61_v30, %v65_v31  ;;  %v2583_v12 = vcombine.high %v1148_v23, %v1152_v24  ;;  %v1156_v30 = vld [vmem:[%s3751_s5 + $0xc0] sm:$0xff] }
  0x54   :  { %v2541_v43 = vcombine.high %v69_v38, %v73_v39  ;;  %v1160_v31 = vld [vmem:[%s3751_s5 + $0xe0] sm:$0xff] }
  0x56   :  { %976 = vmatpush1.bf16.msra.mxu0 %v2534_v46  ;;  %1017 = vmatpush1.bf16.msra.mxu1 %v2536_v47  ;;  %v77_v46 = vld [vmem:[%s3749_s3 + $0x158] sm:$0xff] }
  0x57   :  { %977 = vmatprep.subr.bf16.mxu0 %v2543_v48  ;;  %1018 = vmatprep.subr.bf16.mxu1 %v2545_v49  ;;  %v81_v47 = vld [vmem:[%s3749_s3 + $0x178] sm:$0xff]  ;;  %v2538_v48 = vcombine.low %v68_v36, %v72_v37  ;;  %v2540_v49 = vcombine.low %v69_v38, %v73_v39  ;;  %v1164_v37 = vld [vmem:[%s3751_s5 + $0x100] sm:$0xff]  ;;  %v1165_v39 = vld [vmem:[%s3751_s5 + $0x108] sm:$0xff] }
  0x58   :  { %v2549_v51 = vcombine.high %v77_v46, %v81_v47  ;;  %v1168_v38 = vld [vmem:[%s3751_s5 + $0x120] sm:$0xff] }
  0x5a   :  { %978 = vmatpush1.bf16.msra.mxu0 %v2542_v54  ;;  %1019 = vmatpush1.bf16.msra.mxu1 %v2544_v55  ;;  %v85_v54 = vld [vmem:[%s3749_s3 + $0x198] sm:$0xff] }
  0x5b   :  { %979 = vmatprep.subr.bf16.mxu0 %v2551_v56  ;;  %1020 = vmatprep.subr.bf16.mxu1 %v2553_v57  ;;  %v89_v55 = vld [vmem:[%s3749_s3 + $0x1b8] sm:$0xff]  ;;  %v2546_v56 = vcombine.low %v76_v44, %v80_v45  ;;  %v2548_v57 = vcombine.low %v77_v46, %v81_v47  ;;  %v1172_v45 = vld [vmem:[%s3751_s5 + $0x140] sm:$0xff]  ;;  %v1173_v47 = vld [vmem:[%s3751_s5 + $0x148] sm:$0xff] }
  0x5c   :  { %v2557_v59 = vcombine.high %v85_v54, %v89_v55  ;;  %v1176_v46 = vld [vmem:[%s3751_s5 + $0x160] sm:$0xff] }
  0x5e   :  { %980 = vmatpush1.bf16.msra.mxu0 %v2550_v62  ;;  %1021 = vmatpush1.bf16.msra.mxu1 %v2552_v63  ;;  %v93_v62 = vld [vmem:[%s3749_s3 + $0x1d8] sm:$0xff] }
  0x5f   :  { %981 = vmatprep.subr.bf16.mxu0 %v2559_v0  ;;  %1022 = vmatprep.subr.bf16.mxu1 %v2561_v1  ;;  %v97_v63 = vld [vmem:[%s3749_s3 + $0x1f8] sm:$0xff]  ;;  %v2554_v0 = vcombine.low %v84_v52, %v88_v53  ;;  %v2556_v1 = vcombine.low %v85_v54, %v89_v55  ;;  %v1180_v53 = vld [vmem:[%s3751_s5 + $0x180] sm:$0xff]  ;;  %v1181_v55 = vld [vmem:[%s3751_s5 + $0x188] sm:$0xff] }
  0x60   :  { %v2565_v4 = vcombine.high %v93_v62, %v97_v63  ;;  %v1184_v54 = vld [vmem:[%s3751_s5 + $0x1a0] sm:$0xff] }
  0x62   :  { %982 = vmatpush1.bf16.msra.mxu0 %v2558_v7  ;;  %1023 = vmatpush1.bf16.msra.mxu1 %v2560_v8  ;;  %v1133_v7 = vld [vmem:[%s3751_s5 + $0x8] sm:$0xff] }
  0x63   :  { %1049 = vmatprep.subr.bf16.mxu0 %v2507_v9  ;;  %1090 = vmatprep.subr.bf16.mxu1 %v2509_v10  ;;  %v1137_v8 = vld [vmem:[%s3751_s5 + $0x28] sm:$0xff]  ;;  %v2562_v9 = vcombine.low %v92_v60, %v96_v61  ;;  %v2564_v10 = vcombine.low %v93_v62, %v97_v63  ;;  %v1188_v61 = vld [vmem:[%s3751_s5 + $0x1c0] sm:$0xff] }
  0x64   :  { %v2569_v13 = vcombine.high %v1133_v7, %v1137_v8  ;;  %v1192_v62 = vld [vmem:[%s3751_s5 + $0x1e0] sm:$0xff]  ;;  %v1189_v63 = vld [vmem:[%s3751_s5 + $0x1c8] sm:$0xff] }
  0x65   :  { %1000 = vmatmul.mubr.bf16.vlgmr.msra.gmra.mrb[8].mxu0 %v3229_v16  ;;  %1041 = vmatmul.mubr.bf16.vlgmr.msra.gmra.mrb[8].mxu1 %v3229_v16 }
  0x66   :  { %1050 = vmatpush1.bf16.msra.mxu0 %v2506_v17  ;;  %1091 = vmatpush1.bf16.msra.mxu1 %v2508_v18  ;;  %v1141_v17 = vld [vmem:[%s3751_s5 + $0x48] sm:$0xff] }
  0x67   :  { %1051 = vmatprep.subr.bf16.mxu0 %v2515_v19  ;;  %1092 = vmatprep.subr.bf16.mxu1 %v2517_v20  ;;  %v1145_v18 = vld [vmem:[%s3751_s5 + $0x68] sm:$0xff]  ;;  %v2566_v19 = vcombine.low %v1132_v5, %v1136_v6  ;;  %v2568_v20 = vcombine.low %v1133_v7, %v1137_v8  ;;  %v1134_v6 = vld [vmem:[%s3751_s5 + $0x10] sm:$0xff]  ;;  %v1135_v8 = vld [vmem:[%s3751_s5 + $0x18] sm:$0xff] }
  0x68   :  { %1081 = vmatprep.mubr.bf16.mxu0 %v2848_v3  ;;  %1122 = vmatprep.mubr.bf16.mxu1 %v2848_v3  ;;  %v2577_v22 = vcombine.high %v1141_v17, %v1145_v18  ;;  %v1138_v7 = vld [vmem:[%s3751_s5 + $0x30] sm:$0xff] }
  0x6a   :  { %1052 = vmatpush1.bf16.msra.mxu0 %v2514_v25  ;;  %1093 = vmatpush1.bf16.msra.mxu1 %v2516_v26  ;;  %v1149_v25 = vld [vmem:[%s3751_s5 + $0x88] sm:$0xff] }
  0x6b   :  { %1053 = vmatprep.subr.bf16.mxu0 %v2523_v27  ;;  %1094 = vmatprep.subr.bf16.mxu1 %v2525_v28  ;;  %v1153_v26 = vld [vmem:[%s3751_s5 + $0xa8] sm:$0xff]  ;;  %v2574_v27 = vcombine.low %v1140_v14, %v1144_v15  ;;  %v2576_v28 = vcombine.low %v1141_v17, %v1145_v18  ;;  %v1142_v15 = vld [vmem:[%s3751_s5 + $0x50] sm:$0xff]  ;;  %v1143_v18 = vld [vmem:[%s3751_s5 + $0x58] sm:$0xff] }
  0x6c   :  { %v2585_v29 = vcombine.high %v1149_v25, %v1153_v26  ;;  %v1146_v17 = vld [vmem:[%s3751_s5 + $0x70] sm:$0xff] }
  0x6e   :  { %1054 = vmatpush1.bf16.msra.mxu0 %v2522_v32  ;;  %1095 = vmatpush1.bf16.msra.mxu1 %v2524_v33  ;;  %v1161_v32 = vld [vmem:[%s3751_s5 + $0xe8] sm:$0xff]  ;;  %v2582_v33 = vcombine.low %v1148_v23, %v1152_v24  ;;  %v2579_v23 = vcombine.high %v1142_v15, %v1146_v17 }
  0x6f   :  { %1055 = vmatprep.subr.bf16.mxu0 %v2531_v34  ;;  %1096 = vmatprep.subr.bf16.mxu1 %v2533_v35  ;;  %v2584_v34 = vcombine.low %v1149_v25, %v1153_v26  ;;  %v2591_v35 = vcombine.high %v1156_v30, %v1160_v31  ;;  %v1150_v25 = vld [vmem:[%s3751_s5 + $0x90] sm:$0xff] }
  0x70   :  { %v1154_v26 = vld [vmem:[%s3751_s5 + $0xb0] sm:$0xff] }
  0x72   :  { %1056 = vmatpush1.bf16.msra.mxu0 %v2530_v40  ;;  %1097 = vmatpush1.bf16.msra.mxu1 %v2532_v41  ;;  %v1169_v40 = vld [vmem:[%s3751_s5 + $0x128] sm:$0xff]  ;;  %v2590_v41 = vcombine.low %v1156_v30, %v1160_v31  ;;  %v2587_v30 = vcombine.high %v1150_v25, %v1154_v26 }
  0x73   :  { %1057 = vmatprep.subr.bf16.mxu0 %v2539_v42  ;;  %1098 = vmatprep.subr.bf16.mxu1 %v2541_v43  ;;  %v2599_v43 = vcombine.high %v1164_v37, %v1168_v38  ;;  %v2601_v44 = vcombine.high %v1165_v39, %v1169_v40 }
  0x76   :  { %1058 = vmatpush1.bf16.msra.mxu0 %v2538_v48  ;;  %1099 = vmatpush1.bf16.msra.mxu1 %v2540_v49  ;;  %v1177_v48 = vld [vmem:[%s3751_s5 + $0x168] sm:$0xff]  ;;  %v2598_v49 = vcombine.low %v1164_v37, %v1168_v38 }
  0x77   :  { %1059 = vmatprep.subr.bf16.mxu0 %v2547_v50  ;;  %1100 = vmatprep.subr.bf16.mxu1 %v2549_v51  ;;  %v2600_v50 = vcombine.low %v1165_v39, %v1169_v40  ;;  %v2607_v51 = vcombine.high %v1172_v45, %v1176_v46  ;;  %v2609_v52 = vcombine.high %v1173_v47, %v1177_v48  ;;  %v1166_v39 = vld [vmem:[%s3751_s5 + $0x110] sm:$0xff] }
  0x78   :  { %v1170_v40 = vld [vmem:[%s3751_s5 + $0x130] sm:$0xff] }
  0x7a   :  { %1060 = vmatpush1.bf16.msra.mxu0 %v2546_v56  ;;  %1101 = vmatpush1.bf16.msra.mxu1 %v2548_v57  ;;  %v1185_v56 = vld [vmem:[%s3751_s5 + $0x1a8] sm:$0xff]  ;;  %v2606_v57 = vcombine.low %v1172_v45, %v1176_v46  ;;  %v1174_v46 = vld [vmem:[%s3751_s5 + $0x150] sm:$0xff] }
  0x7b   :  { %1061 = vmatprep.subr.bf16.mxu0 %v2555_v58  ;;  %1102 = vmatprep.subr.bf16.mxu1 %v2557_v59  ;;  %v2608_v58 = vcombine.low %v1173_v47, %v1177_v48  ;;  %v2615_v59 = vcombine.high %v1180_v53, %v1184_v54  ;;  %v2617_v60 = vcombine.high %v1181_v55, %v1185_v56  ;;  %v1178_v47 = vld [vmem:[%s3751_s5 + $0x170] sm:$0xff]  ;;  %v1175_v48 = vld [vmem:[%s3751_s5 + $0x158] sm:$0xff] }
  0x7e   :  { %1062 = vmatpush1.bf16.msra.mxu0 %v2554_v0  ;;  %1103 = vmatpush1.bf16.msra.mxu1 %v2556_v1  ;;  %v1193_v0 = vld [vmem:[%s3751_s5 + $0x1e8] sm:$0xff]  ;;  %v2614_v1 = vcombine.low %v1180_v53, %v1184_v54  ;;  %v1182_v54 = vld [vmem:[%s3751_s5 + $0x190] sm:$0xff] }
  0x7f   :  { %1063 = vmatprep.subr.bf16.mxu0 %v2563_v2  ;;  %1104 = vmatprep.subr.bf16.mxu1 %v2565_v4  ;;  %v2616_v2 = vcombine.low %v1181_v55, %v1185_v56  ;;  %v2623_v4 = vcombine.high %v1188_v61, %v1192_v62  ;;  %v2625_v5 = vcombine.high %v1189_v63, %v1193_v0  ;;  %v1186_v55 = vld [vmem:[%s3751_s5 + $0x1b0] sm:$0xff]  ;;  %v1183_v56 = vld [vmem:[%s3751_s5 + $0x198] sm:$0xff] }
  0x82   :  { %1064 = vmatpush1.bf16.msra.mxu0 %v2562_v9  ;;  %1105 = vmatpush1.bf16.msra.mxu1 %v2564_v10  ;;  %v1139_v9 = vld [vmem:[%s3751_s5 + $0x38] sm:$0xff]  ;;  %v2622_v10 = vcombine.low %v1188_v61, %v1192_v62  ;;  %v1190_v62 = vld [vmem:[%s3751_s5 + $0x1d0] sm:$0xff] }
  0x83   :  { %1516 = vmatprep.subr.bf16.mxu0 %v2567_v11  ;;  %1557 = vmatprep.subr.bf16.mxu1 %v2569_v13  ;;  %v2624_v11 = vcombine.low %v1189_v63, %v1193_v0  ;;  %v2571_v13 = vcombine.high %v1134_v6, %v1138_v7  ;;  %v2573_v14 = vcombine.high %v1135_v8, %v1139_v9  ;;  %v1194_v63 = vld [vmem:[%s3751_s5 + $0x1f0] sm:$0xff]  ;;  %v1191_v0 = vld [vmem:[%s3751_s5 + $0x1d8] sm:$0xff] }
  0x85   :  { %1082 = vmatmul.mubr.bf16.vlgmr.msra.gmra.mrb[12].mxu0 %v3229_v16  ;;  %1123 = vmatmul.mubr.bf16.vlgmr.msra.gmra.mrb[12].mxu1 %v3229_v16  ;;  %v1157_v16 = vld [vmem:[%s3751_s5 + $0xc8] sm:$0xff] }
  0x86   :  { %1517 = vmatpush1.bf16.msra.mxu0 %v2566_v19  ;;  %1558 = vmatpush1.bf16.msra.mxu1 %v2568_v20  ;;  %v2593_v36 = vcombine.high %v1157_v16, %v1161_v32  ;;  %v2592_v42 = vcombine.low %v1157_v16, %v1161_v32  ;;  %v1147_v19 = vld [vmem:[%s3751_s5 + $0x78] sm:$0xff]  ;;  %v3434_v20 = vld [vmem:[%s3752_s2] sm:$0xf]  ;;  %v1158_v16 = vld [vmem:[%s3751_s5 + $0xd0] sm:$0xff] }
  0x87   :  { %1518 = vmatprep.subr.bf16.mxu0 %v2575_v21  ;;  %1559 = vmatprep.subr.bf16.mxu1 %v2577_v22  ;;  %v2570_v21 = vcombine.low %v1134_v6, %v1138_v7  ;;  %v2572_v22 = vcombine.low %v1135_v8, %v1139_v9  ;;  %v2581_v24 = vcombine.high %v1143_v18, %v1147_v19  ;;  %v1162_v32 = vld [vmem:[%s3751_s5 + $0xf0] sm:$0xff]  ;;  %v2784_v9 = vld [vmem:[%s3753_s7 + $0x40] sm:$0xff]  }
  0x88   :  { %1548 = vmatprep.mubr.bf16.mxu0 %v2848_v3  ;;  %1589 = vmatprep.mubr.bf16.mxu1 %v2848_v3  ;;  %v2595_v37 = vcombine.high %v1158_v16, %v1162_v32  ;;  %v2626_v7 = vcombine.low %v1190_v62, %v1194_v63 }
  0x8a   :  { %1519 = vmatpush1.bf16.msra.mxu0 %v2574_v27  ;;  %1560 = vmatpush1.bf16.msra.mxu1 %v2576_v28  ;;  %v1151_v27 = vld [vmem:[%s3751_s5 + $0x98] sm:$0xff] }
  0x8b   :  { %1520 = vmatprep.subr.bf16.mxu0 %v2583_v12  ;;  %1561 = vmatprep.subr.bf16.mxu1 %v2585_v29  ;;  %v1155_v28 = vld [vmem:[%s3751_s5 + $0xb8] sm:$0xff]  ;;  %v2578_v12 = vcombine.low %v1142_v15, %v1146_v17  ;;  %v2580_v29 = vcombine.low %v1143_v18, %v1147_v19  ;;  %v2789_v15 = vld [vmem:[%s3753_s7 + $0xc8] sm:$0xff]   ;;  %v2792_v19 = vld [vmem:[%s3753_s7 + $0x50] sm:$0xff]  }
  0x8c   :  { %v2589_v31 = vcombine.high %v1151_v27, %v1155_v28  ;;  %v2790_v17 = vld [vmem:[%s3753_s7 + $0x8] sm:$0xff]  }
  0x8d   :  { %v2791_v18 = vld [vmem:[%s3753_s7 + $0x88] sm:$0xff]  }
  0x8e   :  { %1521 = vmatpush1.bf16.msra.mxu0 %v2582_v33  ;;  %1562 = vmatpush1.bf16.msra.mxu1 %v2584_v34  ;;  %v1159_v33 = vld [vmem:[%s3751_s5 + $0xd8] sm:$0xff] }
  0x8f   :  { %1522 = vmatprep.subr.bf16.mxu0 %v2591_v35  ;;  %1563 = vmatprep.subr.bf16.mxu1 %v2593_v36  ;;  %v1163_v34 = vld [vmem:[%s3751_s5 + $0xf8] sm:$0xff]  ;;  %v2586_v35 = vcombine.low %v1150_v25, %v1154_v26  ;;  %v2588_v36 = vcombine.low %v1151_v27, %v1155_v28  ;;  %v2800_v27 = vld [vmem:[%s3753_s7 + $0x60] sm:$0xff]  }
  0x90   :  { %v2597_v38 = vcombine.high %v1159_v33, %v1163_v34  ;;  %v2798_v25 = vld [vmem:[%s3753_s7 + $0x18] sm:$0xff]   ;;  %v2801_v28 = vld [vmem:[%s3753_s7 + $0xe0] sm:$0xff]  }
  0x91   :  { %v2799_v26 = vld [vmem:[%s3753_s7 + $0x98] sm:$0xff]  }
  0x92   :  { %1523 = vmatpush1.bf16.msra.mxu0 %v2590_v41  ;;  %1564 = vmatpush1.bf16.msra.mxu1 %v2592_v42  ;;  %v1171_v41 = vld [vmem:[%s3751_s5 + $0x138] sm:$0xff]  ;;  %v2594_v42 = vcombine.low %v1158_v16, %v1162_v32  ;;  %v2806_v16 = vld [vmem:[%s3753_s7 + $0x28] sm:$0xff]  }
  0x93   :  { %1524 = vmatprep.subr.bf16.mxu0 %v2599_v43  ;;  %1565 = vmatprep.subr.bf16.mxu1 %v2601_v44  ;;  %v2596_v43 = vcombine.low %v1159_v33, %v1163_v34  ;;  %v2603_v44 = vcombine.high %v1166_v39, %v1170_v40  ;;  %v2807_v32 = vld [vmem:[%s3753_s7 + $0xa8] sm:$0xff]  }
  0x96   :  { %1525 = vmatpush1.bf16.msra.mxu0 %v2598_v49  ;;  %1566 = vmatpush1.bf16.msra.mxu1 %v2600_v50  ;;  %v1179_v49 = vld [vmem:[%s3751_s5 + $0x178] sm:$0xff]  ;;  %v2602_v50 = vcombine.low %v1166_v39, %v1170_v40  ;;  %v2809_v39 = vld [vmem:[%s3753_s7 + $0xf0] sm:$0xff]  }
  0x97   :  { %1526 = vmatprep.subr.bf16.mxu0 %v2607_v51  ;;  %1567 = vmatprep.subr.bf16.mxu1 %v2609_v52  ;;  %v2611_v52 = vcombine.high %v1174_v46, %v1178_v47  ;;  %v2613_v53 = vcombine.high %v1175_v48, %v1179_v49 }
  0x9a   :  { %1527 = vmatpush1.bf16.msra.mxu0 %v2606_v57  ;;  %1568 = vmatpush1.bf16.msra.mxu1 %v2608_v58  ;;  %v1187_v57 = vld [vmem:[%s3751_s5 + $0x1b8] sm:$0xff]  ;;  %v2610_v58 = vcombine.low %v1174_v46, %v1178_v47 }
  0x9b   :  { %1528 = vmatprep.subr.bf16.mxu0 %v2615_v59  ;;  %1569 = vmatprep.subr.bf16.mxu1 %v2617_v60  ;;  %v2612_v59 = vcombine.low %v1175_v48, %v1179_v49  ;;  %v2619_v60 = vcombine.high %v1182_v54, %v1186_v55  ;;  %v2621_v61 = vcombine.high %v1183_v56, %v1187_v57  ;;  %v2814_v46 = vld [vmem:[%s3753_s7 + $0x38] sm:$0xff]   ;;  %v2816_v48 = vld [vmem:[%s3753_s7 + $0x140] sm:$0xff]  }
  0x9c   :  { %v2815_v47 = vld [vmem:[%s3753_s7 + $0xb8] sm:$0xff]   ;;  %v2817_v49 = vld [vmem:[%s3753_s7 + $0x1c0] sm:$0xff]  }
  0x9e   :  { %1529 = vmatpush1.bf16.msra.mxu0 %v2614_v1  ;;  %1570 = vmatpush1.bf16.msra.mxu1 %v2616_v2  ;;  %v1195_v1 = vld [vmem:[%s3751_s5 + $0x1f8] sm:$0xff]  ;;  %v2618_v2 = vcombine.low %v1182_v54, %v1186_v55 }
  0x9f   :  { %1530 = vmatprep.subr.bf16.mxu0 %v2623_v4  ;;  %1571 = vmatprep.subr.bf16.mxu1 %v2625_v5  ;;  %v2620_v4 = vcombine.low %v1183_v56, %v1187_v57  ;;  %v2627_v5 = vcombine.high %v1190_v62, %v1194_v63  ;;  %v2629_v6 = vcombine.high %v1191_v0, %v1195_v1 }
  0xa0   :  { %v2628_v8 = vcombine.low %v1191_v0, %v1195_v1 }
  0xa2   :  { %1531 = vmatpush1.bf16.msra.mxu0 %v2622_v10  ;;  %1572 = vmatpush1.bf16.msra.mxu1 %v2624_v11  ;;  %v2785_v10 = vld [vmem:[%s3753_s7 + $0xc0] sm:$0xff]  }
  0xa3   :  { %1598 = vmatprep.subr.bf16.mxu0 %v2571_v13  ;;  %1639 = vmatprep.subr.bf16.mxu1 %v2573_v14  ;;  %v2786_v11 = vld [vmem:[%s3753_s7] sm:$0xff]   ;;  %v2788_v14 = vld [vmem:[%s3753_s7 + $0x48] sm:$0xff]  }
  0xa4   :  { %v2787_v13 = vld [vmem:[%s3753_s7 + $0x80] sm:$0xff]  }
  0xa5   :  { %1549 = vmatmul.mubr.bf16.vlgmr.msra.gmra.mrb[16].mxu0 %v3434_v20  ;;  %1590 = vmatmul.mubr.bf16.vlgmr.msra.gmra.mrb[16].mxu1 %v3434_v20 }
  0xa6   :  { %1599 = vmatpush1.bf16.msra.mxu0 %v2570_v21  ;;  %1640 = vmatpush1.bf16.msra.mxu1 %v2572_v22  ;;  %v2794_v21 = vld [vmem:[%s3753_s7 + $0x10] sm:$0xff]  }
  0xa7   :  { %1600 = vmatprep.subr.bf16.mxu0 %v2579_v23  ;;  %1641 = vmatprep.subr.bf16.mxu1 %v2581_v24  ;;  %v2795_v22 = vld [vmem:[%s3753_s7 + $0x90] sm:$0xff]   ;;  %v2796_v23 = vld [vmem:[%s3753_s7 + $0x58] sm:$0xff]  }
  0xa8   :  { %1630 = vmatprep.mubr.bf16.mxu0 %v2848_v3  ;;  %1671 = vmatprep.mubr.bf16.mxu1 %v2848_v3  ;;  %v1167_v3 = vld [vmem:[%s3751_s5 + $0x118] sm:$0xff] }
  0xa9   :  { %v2605_v45 = vcombine.high %v1167_v3, %v1171_v41  ;;  %v2604_v51 = vcombine.low %v1167_v3, %v1171_v41  ;;  %v2797_v24 = vld [vmem:[%s3753_s7 + $0xd8] sm:$0xff]   ;;  %v2810_v41 = vld [vmem:[%s3753_s7 + $0x30] sm:$0xff]  }
  0xaa   :  { %1601 = vmatpush1.bf16.msra.mxu0 %v2578_v12  ;;  %1642 = vmatpush1.bf16.msra.mxu1 %v2580_v29  ;;  %v2802_v12 = vld [vmem:[%s3753_s7 + $0x20] sm:$0xff]  }
  0xab   :  { %1602 = vmatprep.subr.bf16.mxu0 %v2587_v30  ;;  %1643 = vmatprep.subr.bf16.mxu1 %v2589_v31  ;;  %v2803_v29 = vld [vmem:[%s3753_s7 + $0xa0] sm:$0xff]   ;;  %v2804_v30 = vld [vmem:[%s3753_s7 + $0x68] sm:$0xff]  }
  0xac   :  { %v2805_v31 = vld [vmem:[%s3753_s7 + $0xe8] sm:$0xff]  }
  0xae   :  { %1603 = vmatpush1.bf16.msra.mxu0 %v2586_v35  ;;  %1644 = vmatpush1.bf16.msra.mxu1 %v2588_v36 }
  0xaf   :  { %1604 = vmatprep.subr.bf16.mxu0 %v2595_v37  ;;  %1645 = vmatprep.subr.bf16.mxu1 %v2597_v38  ;;  %v2808_v38 = vld [vmem:[%s3753_s7 + $0x70] sm:$0xff]  }
  0xb2   :  { %1605 = vmatpush1.bf16.msra.mxu0 %v2594_v42  ;;  %1646 = vmatpush1.bf16.msra.mxu1 %v2596_v43  ;;  %v2811_v42 = vld [vmem:[%s3753_s7 + $0xb0] sm:$0xff]  }
  0xb3   :  { %1606 = vmatprep.subr.bf16.mxu0 %v2603_v44  ;;  %1647 = vmatprep.subr.bf16.mxu1 %v2605_v45  ;;  %v2812_v44 = vld [vmem:[%s3753_s7 + $0x78] sm:$0xff]  }
  0xb4   :  { %v2813_v45 = vld [vmem:[%s3753_s7 + $0xf8] sm:$0xff]  }
  0xb6   :  { %1607 = vmatpush1.bf16.msra.mxu0 %v2602_v50  ;;  %1648 = vmatpush1.bf16.msra.mxu1 %v2604_v51 }
  0xb7   :  { %1608 = vmatprep.subr.bf16.mxu0 %v2611_v52  ;;  %1649 = vmatprep.subr.bf16.mxu1 %v2613_v53 }
  0xba   :  { %1609 = vmatpush1.bf16.msra.mxu0 %v2610_v58  ;;  %1650 = vmatpush1.bf16.msra.mxu1 %v2612_v59 }
  0xbb   :  { %1610 = vmatprep.subr.bf16.mxu0 %v2619_v60  ;;  %1651 = vmatprep.subr.bf16.mxu1 %v2621_v61 }
  0xbe   :  { %1611 = vmatpush1.bf16.msra.mxu0 %v2618_v2  ;;  %1652 = vmatpush1.bf16.msra.mxu1 %v2620_v4 }
  0xbf   :  { %1612 = vmatprep.subr.bf16.mxu0 %v2627_v5  ;;  %1653 = vmatprep.subr.bf16.mxu1 %v2629_v6 }
  0xc2   :  { %1613 = vmatpush1.bf16.msra.mxu0 %v2626_v7  ;;  %1654 = vmatpush1.bf16.msra.mxu1 %v2628_v8 }
  0xc3   :  { %2695 = vmatprep.subr.bf16.mxu0 %v2784_v9  ;;  %2717 = vmatprep.subr.bf16.mxu1 %v2785_v10 }
  0xc5   :  { %1631 = vmatmul.mubr.bf16.vlgmr.msra.gmra.mrb[20].mxu0 %v3434_v20  ;;  %1672 = vmatmul.mubr.bf16.vlgmr.msra.gmra.mrb[20].mxu1 %v3434_v20  ;;  %v2793_v20 = vld [vmem:[%s3753_s7 + $0xd0] sm:$0xff]  }
  0xc6   :  { %2696 = vmatpush3.bf16.msra.mxu0 %v2786_v11  ;;  %2718 = vmatpush3.bf16.msra.mxu1 %v2787_v13 }
  0xc7   :  { %2697 = vmatprep.subr.bf16.mxu0 %v2788_v14  ;;  %2719 = vmatprep.subr.bf16.mxu1 %v2789_v15 }
  0xca   :  { %2698 = vmatpush3.bf16.msra.mxu0 %v2790_v17  ;;  %2720 = vmatpush3.bf16.msra.mxu1 %v2791_v18 }
  0xcb   :  { %2699 = vmatprep.subr.bf16.mxu0 %v2792_v19  ;;  %2721 = vmatprep.subr.bf16.mxu1 %v2793_v20 }
  0xce   :  { %2700 = vmatpush3.bf16.msra.mxu0 %v2794_v21  ;;  %2722 = vmatpush3.bf16.msra.mxu1 %v2795_v22  ;;  %v1690_v21 = vlaneseq }
  0xcf   :  { %2701 = vmatprep.subr.bf16.mxu0 %v2796_v23  ;;  %2723 = vmatprep.subr.bf16.mxu1 %v2797_v24  ;;  %v3630_v24 = vld [vmem:[%s3754_s6] sm:$0xff] }
  0xd0   :  { %v3624_v22 = vshrl.u32 %v1690_v21, 7 }
  0xd2   :  { %2702 = vmatpush3.bf16.msra.mxu0 %v2798_v25  ;;  %2724 = vmatpush3.bf16.msra.mxu1 %v2799_v26  ;;  %v1692_v23 = vsub.s32 0, %v3624_v22  ;;  %v1700_v25 = vsub.s32 2, %v3624_v22  ;;  %v1696_v26 = vsub.s32 1, %v3624_v22  ;;  %v1720_v21 = vsub.s32 7, %v3624_v22 }
  0xd3   :  { %2703 = vmatprep.subr.bf16.mxu0 %v2800_v27  ;;  %2725 = vmatprep.subr.bf16.mxu1 %v2801_v28  ;;  %v1704_v27 = vsub.s32 3, %v3624_v22 }
  0xd4   :  { %v1693_v28 = vrot.slane %v3630_v24, %v1692_v23  ;;  %v2840_v23 = vld [vmem:[%s3753_s7 + $0x170] sm:$0xff]  }
  0xd6   :  { %2704 = vmatpush3.bf16.msra.mxu0 %v2802_v12  ;;  %2726 = vmatpush3.bf16.msra.mxu1 %v2803_v29  ;;  %v1701_v29 = vrot.slane %v3630_v24, %v1700_v25  ;;  %v2841_v25 = vld [vmem:[%s3753_s7 + $0x1f0] sm:$0xff]  }
  0xd7   :  { %2705 = vmatprep.subr.bf16.mxu0 %v2804_v30  ;;  %2727 = vmatprep.subr.bf16.mxu1 %v2805_v31  ;;  %v1697_v30 = vrot.slane %v3630_v24, %v1696_v26 }
  0xda   :  { %2706 = vmatpush3.bf16.msra.mxu0 %v2806_v16  ;;  %2728 = vmatpush3.bf16.msra.mxu1 %v2807_v32 }
  0xdb   :  { %2707 = vmatprep.subr.bf16.mxu0 %v2808_v38  ;;  %2729 = vmatprep.subr.bf16.mxu1 %v2809_v39 }
  0xde   :  { %2708 = vmatpush3.bf16.msra.mxu0 %v2810_v41  ;;  %2730 = vmatpush3.bf16.msra.mxu1 %v2811_v42 }
  0xdf   :  { %2709 = vmatprep.subr.bf16.mxu0 %v2812_v44  ;;  %2731 = vmatprep.subr.bf16.mxu1 %v2813_v45 }
  0xe2   :  { %2710 = vmatpush3.bf16.msra.mxu0 %v2814_v46  ;;  %2732 = vmatpush3.bf16.msra.mxu1 %v2815_v47 }
  0xe3   :  { %2739 = vmatprep.subr.bf16.mxu0 %v2816_v48  ;;  %2761 = vmatprep.subr.bf16.mxu1 %v2817_v49 }
  0xf8   :  { %v517_v33 = vpop.f32.mrb[0].mxu0  ;;  %v558_v34 = vpop.f32.mrb[0].mxu1 }
  0xf9   :  { %v519_v35 = vpop.f32.mrb[1].mxu0  ;;  %v560_v36 = vpop.f32.mrb[1].mxu1 }
  0xfa   :  { %v521_v37 = vpop.f32.mrb[2].mxu0  ;;  %v562_v40 = vpop.f32.mrb[2].mxu1 }
  0xfb   :  { %v522_v3 = vpop.f32.mrb[3].mxu0  ;;  %v563_v43 = vpop.f32.mrb[3].mxu1 }
 0x118   :  { %v599_v50 = vpop.f32.mrb[4].mxu0  ;;  %v640_v51 = vpop.f32.mrb[4].mxu1 }
 0x119   :  { %v601_v52 = vpop.f32.mrb[5].mxu0  ;;  %v642_v53 = vpop.f32.mrb[5].mxu1 }
 0x11a   :  { %v603_v54 = vpop.f32.mrb[6].mxu0  ;;  %v644_v55 = vpop.f32.mrb[6].mxu1 }
 0x11b   :  { %v604_v56 = vpop.f32.mrb[7].mxu0  ;;  %v645_v57 = vpop.f32.mrb[7].mxu1  ;;  %v2820_v54 = vld [vmem:[%s3753_s7 + $0x148] sm:$0xff]  }
 0x11c   :  { %v2821_v56 = vld [vmem:[%s3753_s7 + $0x1c8] sm:$0xff]  }
 0x11d   :  { %v2822_v57 = vld [vmem:[%s3753_s7 + $0x108] sm:$0xff]  }
 0x138   :  { %v1001_v58 = vpop.f32.mrb[8].mxu0  ;;  %v1042_v60 = vpop.f32.mrb[8].mxu1 }
 0x139   :  { %v1002_v59 = vadd.f32 %v1001_v58, %v517_v33  ;;  %v1003_v61 = vpop.f32.mrb[9].mxu0  ;;  %v1043_v62 = vadd.f32 %v1042_v60, %v558_v34  ;;  %v1044_v0 = vpop.f32.mrb[9].mxu1  ;;  %v1705_v33 = vrot.slane %v3630_v24, %v1704_v27  ;;  %v2823_v58 = vld [vmem:[%s3753_s7 + $0x188] sm:$0xff]   ;;  %v2825_v60 = vld [vmem:[%s3753_s7 + $0x1d0] sm:$0xff]  }
 0x13a   :  { %v1004_v63 = vadd.f32 %v1003_v61, %v519_v35  ;;  %v1005_v1 = vpop.f32.mrb[10].mxu0  ;;  %v1045_v2 = vadd.f32 %v1044_v0, %v560_v36  ;;  %v1046_v4 = vpop.f32.mrb[10].mxu1  ;;  %v2826_v61 = vld [vmem:[%s3753_s7 + $0x110] sm:$0xff]   ;;  %v2829_v0 = vld [vmem:[%s3753_s7 + $0x1d8] sm:$0xff]  }
 0x13b   :  { %v1006_v5 = vpop.f32.mrb[11].mxu0  ;;  %v1047_v6 = vpop.f32.mrb[11].mxu1  ;;  %v2830_v1 = vld [vmem:[%s3753_s7 + $0x118] sm:$0xff]   ;;  %v2832_v4 = vld [vmem:[%s3753_s7 + $0x160] sm:$0xff]  }
 0x13c   :  { %v2833_v5 = vld [vmem:[%s3753_s7 + $0x1e0] sm:$0xff]  }
 0x13d   :  { %v2834_v6 = vld [vmem:[%s3753_s7 + $0x120] sm:$0xff]  }
 0x158   :  { %v1083_v7 = vpop.f32.mrb[12].mxu0  ;;  %v1124_v9 = vpop.f32.mrb[12].mxu1 }
 0x159   :  { %v3616_v8 = vadd.f32 %v1083_v7, %v599_v50  ;;  %v1085_v10 = vpop.f32.mrb[13].mxu0  ;;  %v3618_v11 = vadd.f32 %v1124_v9, %v640_v51  ;;  %v1126_v14 = vpop.f32.mrb[13].mxu1  ;;  %v2818_v50 = vld [vmem:[%s3753_s7 + $0x100] sm:$0xff]   ;;  %v2836_v9 = vld [vmem:[%s3753_s7 + $0x168] sm:$0xff]  }
 0x15a   :  { %v3620_v13 = vadd.f32 %v1085_v10, %v601_v52  ;;  %v1087_v15 = vpop.f32.mrb[14].mxu0  ;;  %v3622_v17 = vadd.f32 %v1126_v14, %v642_v53  ;;  %v1128_v18 = vpop.f32.mrb[14].mxu1  ;;  %v2819_v53 = vld [vmem:[%s3753_s7 + $0x180] sm:$0xff]   ;;  %v2837_v10 = vld [vmem:[%s3753_s7 + $0x1e8] sm:$0xff]   ;;  %v1708_v14 = vsub.s32 4, %v3624_v22 }
 0x15b   :  { %v1088_v19 = vpop.f32.mrb[15].mxu0  ;;  %v1129_v20 = vpop.f32.mrb[15].mxu1  ;;  %v2835_v7 = vld [vmem:[%s3753_s7 + $0x1a0] sm:$0xff]   ;;  %v1716_v15 = vsub.s32 6, %v3624_v22  ;;  %v2838_v18 = vld [vmem:[%s3753_s7 + $0x128] sm:$0xff]  }
 0x15c   :  { %v1712_v19 = vsub.s32 5, %v3624_v22  ;;  %v2839_v20 = vld [vmem:[%s3753_s7 + $0x1a8] sm:$0xff]   ;;  %v1709_v26 = vrot.slane %v3630_v24, %v1708_v14  ;;  %v2842_v22 = vld [vmem:[%s3753_s7 + $0x130] sm:$0xff]  }
 0x178   :  { %v1550_v12 = vpop.f32.mrb[16].mxu0  ;;  %v1591_v16 = vpop.f32.mrb[16].mxu1 }
 0x179   :  { %v1680_v31 = vadd.f32 %v1550_v12, %v1002_v59  ;;  %v1552_v32 = vpop.f32.mrb[17].mxu0  ;;  %v1682_v34 = vadd.f32 %v1591_v16, %v1043_v62  ;;  %v1593_v36 = vpop.f32.mrb[17].mxu1  ;;  %v2824_v59 = vld [vmem:[%s3753_s7 + $0x150] sm:$0xff]   ;;  %v1713_v12 = vrot.slane %v3630_v24, %v1712_v19  ;;  %v1721_v16 = vrot.slane %v3630_v24, %v1720_v21 }
 0x17a   :  { %v1681_v35 = vadd.f32 %v1552_v32, %v1004_v63  ;;  %v1554_v37 = vpop.f32.mrb[18].mxu0  ;;  %v1683_v39 = vadd.f32 %v1593_v36, %v1045_v2  ;;  %v1595_v40 = vpop.f32.mrb[18].mxu1  ;;  %v2827_v62 = vld [vmem:[%s3753_s7 + $0x190] sm:$0xff]   ;;  %v2828_v63 = vld [vmem:[%s3753_s7 + $0x158] sm:$0xff]  }
 0x17b   :  { %v1730_v38 = vadd.f32 %v1693_v28, %v1680_v31  ;;  %v1555_v3 = vpop.f32.mrb[19].mxu0  ;;  %v1732_v41 = vadd.f32 %v1701_v29, %v1682_v34  ;;  %v1596_v43 = vpop.f32.mrb[19].mxu1  ;;  %v2831_v2 = vld [vmem:[%s3753_s7 + $0x198] sm:$0xff]   ;;  %v1717_v28 = vrot.slane %v3630_v24, %v1716_v15  ;;  %v2843_v32 = vld [vmem:[%s3753_s7 + $0x1b0] sm:$0xff]  }
 0x17c   :  { %v1731_v42 = vadd.f32 %v1697_v30, %v1681_v35  ;;  %v1733_v45 = vadd.f32 %v1705_v33, %v1683_v39  ;;  %v2844_v33 = vld [vmem:[%s3753_s7 + $0x178] sm:$0xff]  }
 0x17d   :  { %v1738_v44 = vmax.f32 %v1730_v38, 0.0  ;;  %v1740_v46 = vmax.f32 %v1732_v41, 0.0  ;;  %v2845_v24 = vld [vmem:[%s3753_s7 + $0x1f8] sm:$0xff]  }
 0x17e   :  { %v1739_v47 = vmax.f32 %v1731_v42, 0.0  ;;  %v1741_v48 = vmax.f32 %v1733_v45, 0.0 }
 0x17f   :  { %v1746_v51 = vpack.c.bf16 %v1738_v44, %v1738_v44  ;;  %v1748_v55 = vpack.c.bf16 %v1740_v46, %v1740_v46  ;;  %v2847_v44 = vld [vmem:[%s3753_s7 + $0x1b8] sm:$0xff]  }
 0x180   :  { %v1747_v49 = vpack.c.bf16 %v1739_v47, %v1739_v47  ;;  %v1749_v52 = vpack.c.bf16 %v1741_v48, %v1741_v48 }
 0x182   :  { %2305 = vmatprep.mubr.bf16.mxu0 %v1747_v49  ;;  %2345 = vmatprep.mubr.bf16.mxu1 %v1749_v52 }
 0x183   :  { %2306 = vmatmul.mubr.bf16.vlgmr.msra.gmra.mrb[24].mxu0 %v1746_v51  ;;  %2346 = vmatmul.mubr.bf16.vlgmr.msra.gmra.mrb[24].mxu1 %v1748_v55 }
 0x184   :  { %2740 = vmatpush3.bf16.msra.mxu0 %v2818_v50  ;;  %2762 = vmatpush3.bf16.msra.mxu1 %v2819_v53  ;;  %v2630_v53 = vld [vmem:[%s3755_s8] ss:$0 sm:$0xff] }
 0x185   :  { %2741 = vmatprep.subr.bf16.mxu0 %v2820_v54  ;;  %2763 = vmatprep.subr.bf16.mxu1 %v2821_v56 }
 0x188   :  { %2742 = vmatpush3.bf16.msra.mxu0 %v2822_v57  ;;  %2764 = vmatpush3.bf16.msra.mxu1 %v2823_v58 }
 0x189   :  { %2743 = vmatprep.subr.bf16.mxu0 %v2824_v59  ;;  %2765 = vmatprep.subr.bf16.mxu1 %v2825_v60 }
 0x18c   :  { %2744 = vmatpush3.bf16.msra.mxu0 %v2826_v61  ;;  %2766 = vmatpush3.bf16.msra.mxu1 %v2827_v62 }
 0x18d   :  { %2745 = vmatprep.subr.bf16.mxu0 %v2828_v63  ;;  %2767 = vmatprep.subr.bf16.mxu1 %v2829_v0 }
 0x190   :  { %2746 = vmatpush3.bf16.msra.mxu0 %v2830_v1  ;;  %2768 = vmatpush3.bf16.msra.mxu1 %v2831_v2 }
 0x191   :  { %2747 = vmatprep.subr.bf16.mxu0 %v2832_v4  ;;  %2769 = vmatprep.subr.bf16.mxu1 %v2833_v5 }
 0x194   :  { %2748 = vmatpush3.bf16.msra.mxu0 %v2834_v6  ;;  %2770 = vmatpush3.bf16.msra.mxu1 %v2835_v7 }
 0x195   :  { %2749 = vmatprep.subr.bf16.mxu0 %v2836_v9  ;;  %2771 = vmatprep.subr.bf16.mxu1 %v2837_v10 }
 0x198   :  { %v1632_v27 = vpop.f32.mrb[20].mxu0  ;;  %2750 = vmatpush3.bf16.msra.mxu0 %v2838_v18  ;;  %v1673_v30 = vpop.f32.mrb[20].mxu1  ;;  %2772 = vmatpush3.bf16.msra.mxu1 %v2839_v20 }
 0x199   :  { %v1684_v29 = vadd.f32 %v1632_v27, %v3616_v8  ;;  %v1634_v31 = vpop.f32.mrb[21].mxu0  ;;  %2751 = vmatprep.subr.bf16.mxu0 %v2840_v23  ;;  %v1686_v34 = vadd.f32 %v1673_v30, %v3618_v11  ;;  %v1675_v36 = vpop.f32.mrb[21].mxu1  ;;  %2773 = vmatprep.subr.bf16.mxu1 %v2841_v25  ;;  %v2846_v11 = vld [vmem:[%s3753_s7 + $0x138] sm:$0xff]  }
 0x19a   :  { %v1685_v35 = vadd.f32 %v1634_v31, %v3620_v13  ;;  %v1636_v8 = vpop.f32.mrb[22].mxu0  ;;  %v1687_v38 = vadd.f32 %v1675_v36, %v3622_v17  ;;  %v1677_v39 = vpop.f32.mrb[22].mxu1 }
 0x19b   :  { %v1734_v37 = vadd.f32 %v1709_v26, %v1684_v29  ;;  %v1637_v40 = vpop.f32.mrb[23].mxu0  ;;  %v1736_v3 = vadd.f32 %v1717_v28, %v1686_v34  ;;  %v1678_v42 = vpop.f32.mrb[23].mxu1 }
 0x19c   :  { %v1735_v41 = vadd.f32 %v1713_v12, %v1685_v35  ;;  %2752 = vmatpush3.bf16.msra.mxu0 %v2842_v22  ;;  %v1737_v43 = vadd.f32 %v1721_v16, %v1687_v38  ;;  %2774 = vmatpush3.bf16.msra.mxu1 %v2843_v32 }
 0x19d   :  { %v1742_v13 = vmax.f32 %v1734_v37, 0.0  ;;  %2753 = vmatprep.subr.bf16.mxu0 %v2844_v33  ;;  %v1744_v45 = vmax.f32 %v1736_v3, 0.0  ;;  %2775 = vmatprep.subr.bf16.mxu1 %v2845_v24 }
 0x19e   :  { %v1743_v17 = vmax.f32 %v1735_v41, 0.0  ;;  %v1745_v46 = vmax.f32 %v1737_v43, 0.0 }
 0x19f   :  { %v1750_v48 = vpack.c.bf16 %v1742_v13, %v1742_v13  ;;  %v1752_v50 = vpack.c.bf16 %v1744_v45, %v1744_v45 }
 0x1a0   :  { %v1751_v47 = vpack.c.bf16 %v1743_v17, %v1743_v17  ;;  %2754 = vmatpush3.bf16.msra.mxu0 %v2846_v11  ;;  %v1753_v49 = vpack.c.bf16 %v1745_v46, %v1745_v46  ;;  %2776 = vmatpush3.bf16.msra.mxu1 %v2847_v44 }
 0x1a2   :  { %2385 = vmatprep.mubr.bf16.mxu0 %v1751_v47  ;;  %2425 = vmatprep.mubr.bf16.mxu1 %v1753_v49 }
 0x1a3   :  { %2386 = vmatmul.mubr.bf16.vlgmr.msra.gmra.mrb[28].mxu0 %v1750_v48  ;;  %2426 = vmatmul.mubr.bf16.vlgmr.msra.gmra.mrb[28].mxu1 %v1752_v50 }
 0x256   :  { %v2711_v51 = vpop.f32.mrb[24].mxu0  ;;  %v2733_v52 = vpop.f32.mrb[24].mxu1 }
 0x257   :  { %v2712_v54 = vpop.f32.mrb[25].mxu0  ;;  %v2734_v56 = vpop.f32.mrb[25].mxu1 }
 0x258   :  { %v2713_v55 = vadd.f32 %v2712_v54, %v2711_v51  ;;  %v2714_v57 = vpop.f32.mrb[26].mxu0  ;;  %v2735_v58 = vadd.f32 %v2734_v56, %v2733_v52  ;;  %v2736_v59 = vpop.f32.mrb[26].mxu1 }
 0x259   :  { %v2715_v60 = vpop.f32.mrb[27].mxu0  ;;  %v2737_v62 = vpop.f32.mrb[27].mxu1 }
 0x25a   :  { %v2308_v61 = vadd.f32 %v2713_v55, %v2630_v53 }
 0x25c   :  { %v2348_v63 = vadd.f32 %v2735_v58, %v2308_v61 }
 0x276   :  { %v2755_v0 = vpop.f32.mrb[28].mxu0  ;;  %v2777_v1 = vpop.f32.mrb[28].mxu1 }
 0x277   :  { %v2756_v2 = vpop.f32.mrb[29].mxu0  ;;  %v2778_v5 = vpop.f32.mrb[29].mxu1 }
 0x278   :  { %v2757_v4 = vadd.f32 %v2756_v2, %v2755_v0  ;;  %v2758_v6 = vpop.f32.mrb[30].mxu0  ;;  %v2779_v7 = vadd.f32 %v2778_v5, %v2777_v1  ;;  %v2780_v9 = vpop.f32.mrb[30].mxu1 }
 0x279   :  { %v2759_v10 = vpop.f32.mrb[31].mxu0  ;;  %v2781_v15 = vpop.f32.mrb[31].mxu1 }
 0x27a   :  { %v2388_v14 = vadd.f32 %v2757_v4, %v2348_v63 }
 0x27c   :  { %v2428_v18 = vadd.f32 %v2779_v7, %v2388_v14 }
 0x27e   :  { %2433 = vst [vmem:[%s3756_s9] sm:$0xff] %v2428_v18 }

</bundles_post_ra>
